<compile_context>
chip_gen: v7x
topology: tpu7x:2x2x1
jax: 0.10.0
libtpu: 0.0.40
codegen_flags: <defaults>
</compile_context>

<pallas_src>
import functools

import jax
import jax.numpy as jnp
from jax.experimental import pallas as pl
from jax.experimental.pallas import tpu as pltpu


def _round_up(x, m):
    return ((x + m - 1) // m) * m


# -------------------------------------------------------------------------------
# Per-type projection: z = x @ W_comb + b_comb   (W_comb = W_fc_in @ W_gat, folded)
# also emits fused per-node attention logits  scores = z @ [attn_r | attn_l]  (N, 2)
# -------------------------------------------------------------------------------
def _proj_kernel(x_ref, w_ref, b_ref, alr_ref, z_ref, s_ref):
    z = jnp.dot(x_ref[...].astype(jnp.bfloat16), w_ref[...],
                preferred_element_type=jnp.float32) + b_ref[...]
    z_ref[...] = z.astype(z_ref.dtype)                          # bf16 for later MXU use
    s_ref[...] = jnp.dot(z, alr_ref[...], preferred_element_type=jnp.float32)


def project(x, w_comb, b_comb, attn_lr):
    n, d_in = x.shape
    hdim = w_comb.shape[1]
    tm = min(256, _round_up(n, 8))
    n_pad = _round_up(n, tm)
    if n_pad > n:
        x = jnp.pad(x, ((0, n_pad - n), (0, 0)))
    z, s = pl.pallas_call(
        _proj_kernel,
        grid=(n_pad // tm,),
        in_specs=[
            pl.BlockSpec((tm, d_in), lambda i: (i, 0)),
            pl.BlockSpec((d_in, hdim), lambda i: (0, 0)),
            pl.BlockSpec((1, hdim), lambda i: (0, 0)),
            pl.BlockSpec((hdim, 2), lambda i: (0, 0)),
        ],
        out_specs=(
            pl.BlockSpec((tm, hdim), lambda i: (i, 0)),
            pl.BlockSpec((tm, 2), lambda i: (i, 0)),
        ),
        out_shape=(
            jax.ShapeDtypeStruct((n_pad, hdim), jnp.bfloat16),
            jax.ShapeDtypeStruct((n_pad, 2), jnp.float32),
        ),
        compiler_params=pltpu.CompilerParams(dimension_semantics=("parallel",)),
    )(x, w_comb.astype(jnp.bfloat16), b_comb, attn_lr)
    return z[:n], s[:n]


# -------------------------------------------------------------------------------
# Flash-style dense single-head GATConv (DGL semantics) + fused predict head
# -------------------------------------------------------------------------------
def _gat_kernel(er_ref, el_ref, zk_ref, adj_ref, b_ref, pw_ref, pb_ref,
                h_ref, pred_ref, m_sc, l_sc, acc_sc):
    ki = pl.program_id(1)

    @pl.when(ki == 0)
    def _init():
        m_sc[...] = jnp.full_like(m_sc, -jnp.inf)
        l_sc[...] = jnp.zeros_like(l_sc)
        acc_sc[...] = jnp.zeros_like(acc_sc)

    # e[i, j] = LeakyReLU(er[dst i] + el[src j]) over this (tq, tk) tile
    e = er_ref[...] + el_ref[...]                     # (tq,1) + (1,tk) -> (tq,tk)
    e = jnp.where(e > 0, e, 0.2 * e)                  # LeakyReLU(0.2)
    mask = adj_ref[...] > 0                           # computed once, reused twice
    masked = jnp.where(mask, e, -1e30)

    # online (flash) softmax over incoming edges of each destination row
    m_cur = jnp.max(masked, axis=1, keepdims=True)
    m_new = jnp.maximum(m_sc[...], m_cur)
    alpha = jnp.exp(m_sc[...] - m_new)
    p = jnp.where(mask, jnp.exp(masked - m_new), 0.0)
    l_sc[...] = alpha * l_sc[...] + jnp.sum(p, axis=1, keepdims=True)
    acc_sc[...] = alpha * acc_sc[...] + jnp.dot(
        p.astype(jnp.bfloat16), zk_ref[...], preferred_element_type=jnp.float32)
    m_sc[...] = m_new

    @pl.when(ki == pl.num_programs(1) - 1)
    def _finalize():
        denom = jnp.maximum(l_sc[...], 1e-30)         # guard all-masked (padded) rows
        h = acc_sc[...] * pl.reciprocal(denom, approx=True) + b_ref[...]
        h = jnp.where(h > 0, h, jnp.exp(jnp.minimum(h, 0.0)) - 1.0)   # ELU(alpha=1)
        h_ref[...] = h
        # fused predict head (nn.Linear); non-predict-type rows are sliced off outside
        pred_ref[...] = jnp.dot(h.astype(jnp.bfloat16), pw_ref[...],
                                preferred_element_type=jnp.float32) + pb_ref[...]


def _gat_tiles(n):
    if n <= 512:
        n_pad = _round_up(n, 128)
        return n_pad, 128, n_pad          # (n_pad, tq, tk)
    n_pad = _round_up(n, 512)
    return n_pad, 256, 512


def gat_conv(z, scores, adj_mask, gat_b, pred_w, pred_b):
    n, hdim = z.shape
    out_dim = pred_w.shape[1]
    n_pad, tq, tk = _gat_tiles(n)
    if n_pad > n:
        pad = n_pad - n
        z = jnp.pad(z, ((0, pad), (0, 0)))
        scores = jnp.pad(scores, ((0, pad), (0, 0)))
        adj_mask = jnp.pad(adj_mask, ((0, pad), (0, pad)))
    er = scores[:, 0:1]                        # (n_pad, 1) destination logits
    el = scores[:, 1].reshape(1, n_pad)        # (1, n_pad) source logits (lane-dense row)

    h, pred = pl.pallas_call(
        _gat_kernel,
        grid=(n_pad // tq, n_pad // tk),
        in_specs=[
            pl.BlockSpec((tq, 1), lambda qi, ki: (qi, 0)),         # er (dst)
            pl.BlockSpec((1, tk), lambda qi, ki: (0, ki)),         # el (src, row)
            pl.BlockSpec((tk, hdim), lambda qi, ki: (ki, 0)),      # z values (bf16)
            pl.BlockSpec((tq, tk), lambda qi, ki: (qi, ki)),       # adjacency mask (bf16)
            pl.BlockSpec((1, hdim), lambda qi, ki: (0, 0)),        # GAT bias
            pl.BlockSpec((hdim, out_dim), lambda qi, ki: (0, 0)),  # predict W (bf16)
            pl.BlockSpec((1, out_dim), lambda qi, ki: (0, 0)),     # predict b
        ],
        out_specs=(
            pl.BlockSpec((tq, hdim), lambda qi, ki: (qi, 0)),
            pl.BlockSpec((tq, out_dim), lambda qi, ki: (qi, 0)),
        ),
        out_shape=(
            jax.ShapeDtypeStruct((n_pad, hdim), jnp.float32),
            jax.ShapeDtypeStruct((n_pad, out_dim), jnp.float32),
        ),
        scratch_shapes=[
            pltpu.VMEM((tq, 1), jnp.float32),     # running max
            pltpu.VMEM((tq, 1), jnp.float32),     # running denominator
            pltpu.VMEM((tq, hdim), jnp.float32),  # un-normalized accumulator
        ],
        compiler_params=pltpu.CompilerParams(
            dimension_semantics=("parallel", "arbitrary"),
            vmem_limit_bytes=48 * 1024 * 1024),
    )(er, el, z, adj_mask, gat_b, pred_w.astype(jnp.bfloat16), pred_b)
    return h, pred


# -------------------------------------------------------------------------------
# Merged pos/neg truncated -logsigmoid loss (single pallas_call, scalar SMEM output)
# -------------------------------------------------------------------------------
def _loss_kernel(hps_ref, hpd_ref, hns_ref, hnd_ref, o_ref, *, k_t):
    # NOTE: reproduces the torch reference exactly.  With num_heads == 1 the torch
    # code's `torch.sum(h[src] * h[dst], dim=1)` only removes the singleton head axis,
    # so the "score" is the per-feature elementwise product (E, hidden) and the loss
    # reduces over all E*hidden values, with a separate threshold per score set.
    def truncated_neg_logsigmoid_sum(hs, hd):
        score = hs * hd
        # logsigmoid(x) = min(x, 0) - log1p(exp(-|x|))   (numerically stable)
        loss = jnp.minimum(score, 0.0) - jnp.log1p(jnp.exp(-jnp.abs(score)))
        hold = k_t * jnp.max(loss)
        loss = jnp.where(loss > hold, 0.0, loss)
        return -jnp.sum(loss)

    o_ref[0, 0] = (truncated_neg_logsigmoid_sum(hps_ref[...], hpd_ref[...]) +
                   truncated_neg_logsigmoid_sum(hns_ref[...], hnd_ref[...]))


def edge_loss(h_pos_src, h_pos_dst, h_neg_src, h_neg_dst, k_t):
    # TODO(synk): for very large E, tile over edges (two-pass max for the threshold)
    # and gather rows in-kernel via PrefetchScalarGridSpec + pl.Element instead of the
    # XLA-level gathers feeding this call.
    kern = functools.partial(_loss_kernel, k_t=float(k_t))
    vmem = pl.BlockSpec(memory_space=pltpu.MemorySpace.VMEM)
    return pl.pallas_call(
        kern,
        in_specs=[vmem, vmem, vmem, vmem],
        out_specs=pl.BlockSpec(memory_space=pltpu.MemorySpace.SMEM),
        out_shape=jax.ShapeDtypeStruct((1, 1), jnp.float32),
    )(h_pos_src, h_pos_dst, h_neg_src, h_neg_dst)


# --------------------------------- model wrapper ---------------------------------
def init_params(key, ntype_in_dims, in_dim, hidden_dim, out_dim):
    params = {"fc_in": {}}
    for ntype in sorted(ntype_in_dims):
        key, k1, k2 = jax.random.split(key, 3)
        d = ntype_in_dims[ntype]
        params["fc_in"][ntype] = (
            0.1 * jax.random.normal(k1, (d, in_dim), jnp.float32),
            0.1 * jax.random.normal(k2, (1, in_dim), jnp.float32),
        )
    key, k1, k2, k3, k4, k5, k6 = jax.random.split(key, 7)
    params["gat_w"] = 0.1 * jax.random.normal(k1, (in_dim, hidden_dim), jnp.float32)
    params["attn_l"] = 0.1 * jax.random.normal(k2, (hidden_dim, 1), jnp.float32)
    params["attn_r"] = 0.1 * jax.random.normal(k3, (hidden_dim, 1), jnp.float32)
    params["gat_b"] = 0.1 * jax.random.normal(k4, (1, hidden_dim), jnp.float32)
    params["pred_w"] = 0.1 * jax.random.normal(k5, (hidden_dim, out_dim), jnp.float32)
    params["pred_b"] = 0.1 * jax.random.normal(k6, (1, out_dim), jnp.float32)
    return params


def hgnnd_forward(params, feats, adj, pos_src, pos_dst, neg_src, neg_dst,
                  alpha_t, k_max, ntype_counts, predict_type):
    ntype_order = sorted(feats)   # dgl.to_homogeneous orders node types alphabetically
    # fused [attn_r | attn_l]: column 0 -> destination logit, column 1 -> source logit
    attn_lr = jnp.concatenate([params["attn_r"], params["attn_l"]], axis=1)   # (H, 2)

    z_parts, s_parts = [], []
    for t in ntype_order:
        w_in, b_in = params["fc_in"][t]
        # fold fc_in (Linear with bias) and GATConv.fc (Linear, no bias) into one matmul
        w_comb = jnp.dot(w_in, params["gat_w"])
        b_comb = jnp.dot(b_in, params["gat_w"])
        z_t, s_t = project(feats[t], w_comb, b_comb, attn_lr)
        z_parts.append(z_t)
        s_parts.append(s_t)
    z = jnp.concatenate(z_parts, axis=0)        # (N, H) bf16 homogeneous node features
    scores = jnp.concatenate(s_parts, axis=0)   # (N, 2) f32 attention logits

    adj_mask = (adj > 0).astype(jnp.bfloat16)   # bf16 mask: half the N^2 HBM traffic
    h_full, pred_full = gat_conv(z, scores, adj_mask, params["gat_b"],
                                 params["pred_w"], params["pred_b"])

    # "if self.k_T > alpha_T: self.k_T = alpha_T" -> module-state mutation kept host-side
    k_t = alpha_t if k_max > alpha_t else k_max
    loss = edge_loss(jnp.take(h_full, pos_src, axis=0),
                     jnp.take(h_full, pos_dst, axis=0),
                     jnp.take(h_full, neg_src, axis=0),
                     jnp.take(h_full, neg_dst, axis=0), k_t)[0, 0]

    # predict head output for nodes of predict_type (a contiguous block in homogeneous
    # order); already computed inside the GAT kernel's finalize step.
    start = 0
    for t in ntype_order:
        if t == predict_type:
            break
        start += ntype_counts[t]
    out = pred_full[start:start + ntype_counts[predict_type]]
    out = out[:, None, :]   # torch GATConv keeps a num_heads=1 axis -> (N_t, 1, out_dim)
    return loss, out


if __name__ == "__main__":
    key = jax.random.PRNGKey(0)
    ntype_in_dims = {"user": 12, "item": 10}
    ntype_counts = {"user": 8, "item": 8}
    in_dim, hidden_dim, out_dim = 16, 32, 8
    predict_type, k_max, alpha_t = "user", 0.5, 0.3
    n_total = sum(ntype_counts.values())
    n_edges = 8

    key, *ks = jax.random.split(key, 8)
    feats = {
        "item": jax.random.normal(ks[0], (ntype_counts["item"], ntype_in_dims["item"]), jnp.float32),
        "user": jax.random.normal(ks[1], (ntype_counts["user"], ntype_in_dims["user"]), jnp.float32),
    }
    adj = jnp.maximum(
        jax.random.bernoulli(ks[2], 0.3, (n_total, n_total)).astype(jnp.float32),
        jnp.eye(n_total, dtype=jnp.float32))   # add self loops
    pos_src = jax.random.randint(ks[3], (n_edges,), 0, n_total)
    pos_dst = jax.random.randint(ks[4], (n_edges,), 0, n_total)
    neg_src = jax.random.randint(ks[5], (n_edges,), 0, n_total)
    neg_dst = jax.random.randint(ks[6], (n_edges,), 0, n_total)

    params = init_params(jax.random.PRNGKey(42), ntype_in_dims, in_dim, hidden_dim, out_dim)

    fwd = jax.jit(functools.partial(
        hgnnd_forward, alpha_t=alpha_t, k_max=k_max,
        ntype_counts=ntype_counts, predict_type=predict_type))
    loss, out = fwd(params, feats, adj, pos_src, pos_dst, neg_src, neg_dst)
    jax.block_until_ready((loss, out))
    assert out.shape == (ntype_counts[predict_type], 1, out_dim)
    assert bool(jnp.isfinite(loss))
    print("KERNEL_OK")
</pallas_src>

<mosaic_0001>
module attributes {stable_mosaic.version = 11 : i64} {
  func.func @_proj_kernel(%arg0: i32, %arg1: memref<8x10xf32, #tpu.memory_space<vmem>>, %arg2: memref<10x32xbf16, #tpu.memory_space<vmem>>, %arg3: memref<1x32xf32, #tpu.memory_space<vmem>>, %arg4: memref<32x2xf32, #tpu.memory_space<vmem>>, %arg5: memref<8x32xbf16, #tpu.memory_space<vmem>>, %arg6: memref<8x2xf32, #tpu.memory_space<vmem>>) attributes {dimension_semantics = [#tpu.dimension_semantics<parallel>], iteration_bounds = array<i64: 1>, scalar_prefetch = 0 : i64, scratch_operands = 0 : i64, tpu.core_type = #tpu.core_type<tc>, window_params = [{transform_indices = @transform_0, window_bounds = array<i64: 8, 10>}, {pipeline_mode = #tpu.pipeline_mode<synchronous>, transform_indices = @transform_1, window_bounds = array<i64: 10, 32>}, {pipeline_mode = #tpu.pipeline_mode<synchronous>, transform_indices = @transform_2, window_bounds = array<i64: 1, 32>}, {pipeline_mode = #tpu.pipeline_mode<synchronous>, transform_indices = @transform_3, window_bounds = array<i64: 32, 2>}, {transform_indices = @transform_4, window_bounds = array<i64: 8, 32>}, {transform_indices = @transform_5, window_bounds = array<i64: 8, 2>}]} {
    %c0 = arith.constant 0 : index
    %c0_0 = arith.constant 0 : index
    %0 = vector.load %arg1[%c0, %c0_0] : memref<8x10xf32, #tpu.memory_space<vmem>>, vector<8x10xf32>
    %1 = arith.truncf %0 : vector<8x10xf32> to vector<8x10xbf16>
    %c0_1 = arith.constant 0 : index
    %c0_2 = arith.constant 0 : index
    %2 = vector.load %arg2[%c0_1, %c0_2] : memref<10x32xbf16, #tpu.memory_space<vmem>>, vector<10x32xbf16>
    %cst = arith.constant dense<0.000000e+00> : vector<8x32xf32>
    %3 = tpu.matmul %1, %2, %cst {dimension_numbers = #tpu.dot_dimension_numbers<[1], [0], [0], [1], [0, 0, 1, 1], [], []>} : vector<8x10xbf16>, vector<10x32xbf16>, vector<8x32xf32> -> vector<8x32xf32>
    %c0_3 = arith.constant 0 : index
    %c0_4 = arith.constant 0 : index
    %4 = vector.load %arg3[%c0_3, %c0_4] : memref<1x32xf32, #tpu.memory_space<vmem>>, vector<1x32xf32>
    %5 = vector.broadcast %4 : vector<1x32xf32> to vector<8x32xf32>
    %6 = arith.addf %3, %5 : vector<8x32xf32>
    %7 = arith.truncf %6 : vector<8x32xf32> to vector<8x32xbf16>
    %c0_5 = arith.constant 0 : index
    %c0_6 = arith.constant 0 : index
    %8 = vector.load %arg5[%c0_5, %c0_6] : memref<8x32xbf16, #tpu.memory_space<vmem>>, vector<8x32xbf16>
    tpu.vector_store %arg5[%c0_5, %c0_6], %7 {strides = array<i32>} : memref<8x32xbf16, #tpu.memory_space<vmem>>, vector<8x32xbf16>,
    %c0_7 = arith.constant 0 : index
    %c0_8 = arith.constant 0 : index
    %9 = vector.load %arg4[%c0_7, %c0_8] : memref<32x2xf32, #tpu.memory_space<vmem>>, vector<32x2xf32>
    %cst_9 = arith.constant dense<0.000000e+00> : vector<8x2xf32>
    %10 = tpu.matmul %6, %9, %cst_9 {dimension_numbers = #tpu.dot_dimension_numbers<[1], [0], [0], [1], [0, 0, 1, 1], [], []>} : vector<8x32xf32>, vector<32x2xf32>, vector<8x2xf32> -> vector<8x2xf32>
    %c0_10 = arith.constant 0 : index
    %c0_11 = arith.constant 0 : index
    %11 = vector.load %arg6[%c0_10, %c0_11] : memref<8x2xf32, #tpu.memory_space<vmem>>, vector<8x2xf32>
    tpu.vector_store %arg6[%c0_10, %c0_11], %10 {strides = array<i32>} : memref<8x2xf32, #tpu.memory_space<vmem>>, vector<8x2xf32>,
    return
  }
  func.func @transform_0(%arg0: i32) -> (i32, i32) {
    %c0_i32 = arith.constant 0 : i32
    %c0_i32_0 = arith.constant 0 : i32
    return %arg0, %c0_i32 : i32, i32
  }
  func.func @transform_1(%arg0: i32) -> (i32, i32) {
    %c0_i32 = arith.constant 0 : i32
    %c0_i32_0 = arith.constant 0 : i32
    %c0_i32_1 = arith.constant 0 : i32
    return %c0_i32, %c0_i32_0 : i32, i32
  }
  func.func @transform_2(%arg0: i32) -> (i32, i32) {
    %c0_i32 = arith.constant 0 : i32
    %c0_i32_0 = arith.constant 0 : i32
    %c0_i32_1 = arith.constant 0 : i32
    return %c0_i32, %c0_i32_0 : i32, i32
  }
  func.func @transform_3(%arg0: i32) -> (i32, i32) {
    %c0_i32 = arith.constant 0 : i32
    %c0_i32_0 = arith.constant 0 : i32
    %c0_i32_1 = arith.constant 0 : i32
    return %c0_i32, %c0_i32_0 : i32, i32
  }
  func.func @transform_4(%arg0: i32) -> (i32, i32) {
    %c0_i32 = arith.constant 0 : i32
    %c0_i32_0 = arith.constant 0 : i32
    return %arg0, %c0_i32 : i32, i32
  }
  func.func @transform_5(%arg0: i32) -> (i32, i32) {
    %c0_i32 = arith.constant 0 : i32
    %c0_i32_0 = arith.constant 0 : i32
    return %arg0, %c0_i32 : i32, i32
  }
}

module attributes {stable_mosaic.version = 11 : i64} {
  func.func @_proj_kernel(%arg0: i32, %arg1: memref<8x12xf32, #tpu.memory_space<vmem>>, %arg2: memref<12x32xbf16, #tpu.memory_space<vmem>>, %arg3: memref<1x32xf32, #tpu.memory_space<vmem>>, %arg4: memref<32x2xf32, #tpu.memory_space<vmem>>, %arg5: memref<8x32xbf16, #tpu.memory_space<vmem>>, %arg6: memref<8x2xf32, #tpu.memory_space<vmem>>) attributes {dimension_semantics = [#tpu.dimension_semantics<parallel>], iteration_bounds = array<i64: 1>, scalar_prefetch = 0 : i64, scratch_operands = 0 : i64, tpu.core_type = #tpu.core_type<tc>, window_params = [{transform_indices = @transform_0, window_bounds = array<i64: 8, 12>}, {pipeline_mode = #tpu.pipeline_mode<synchronous>, transform_indices = @transform_1, window_bounds = array<i64: 12, 32>}, {pipeline_mode = #tpu.pipeline_mode<synchronous>, transform_indices = @transform_2, window_bounds = array<i64: 1, 32>}, {pipeline_mode = #tpu.pipeline_mode<synchronous>, transform_indices = @transform_3, window_bounds = array<i64: 32, 2>}, {transform_indices = @transform_4, window_bounds = array<i64: 8, 32>}, {transform_indices = @transform_5, window_bounds = array<i64: 8, 2>}]} {
    %c0 = arith.constant 0 : index
    %c0_0 = arith.constant 0 : index
    %0 = vector.load %arg1[%c0, %c0_0] : memref<8x12xf32, #tpu.memory_space<vmem>>, vector<8x12xf32>
    %1 = arith.truncf %0 : vector<8x12xf32> to vector<8x12xbf16>
    %c0_1 = arith.constant 0 : index
    %c0_2 = arith.constant 0 : index
    %2 = vector.load %arg2[%c0_1, %c0_2] : memref<12x32xbf16, #tpu.memory_space<vmem>>, vector<12x32xbf16>
    %cst = arith.constant dense<0.000000e+00> : vector<8x32xf32>
    %3 = tpu.matmul %1, %2, %cst {dimension_numbers = #tpu.dot_dimension_numbers<[1], [0], [0], [1], [0, 0, 1, 1], [], []>} : vector<8x12xbf16>, vector<12x32xbf16>, vector<8x32xf32> -> vector<8x32xf32>
    %c0_3 = arith.constant 0 : index
    %c0_4 = arith.constant 0 : index
    %4 = vector.load %arg3[%c0_3, %c0_4] : memref<1x32xf32, #tpu.memory_space<vmem>>, vector<1x32xf32>
    %5 = vector.broadcast %4 : vector<1x32xf32> to vector<8x32xf32>
    %6 = arith.addf %3, %5 : vector<8x32xf32>
    %7 = arith.truncf %6 : vector<8x32xf32> to vector<8x32xbf16>
    %c0_5 = arith.constant 0 : index
    %c0_6 = arith.constant 0 : index
    %8 = vector.load %arg5[%c0_5, %c0_6] : memref<8x32xbf16, #tpu.memory_space<vmem>>, vector<8x32xbf16>
    tpu.vector_store %arg5[%c0_5, %c0_6], %7 {strides = array<i32>} : memref<8x32xbf16, #tpu.memory_space<vmem>>, vector<8x32xbf16>,
    %c0_7 = arith.constant 0 : index
    %c0_8 = arith.constant 0 : index
    %9 = vector.load %arg4[%c0_7, %c0_8] : memref<32x2xf32, #tpu.memory_space<vmem>>, vector<32x2xf32>
    %cst_9 = arith.constant dense<0.000000e+00> : vector<8x2xf32>
    %10 = tpu.matmul %6, %9, %cst_9 {dimension_numbers = #tpu.dot_dimension_numbers<[1], [0], [0], [1], [0, 0, 1, 1], [], []>} : vector<8x32xf32>, vector<32x2xf32>, vector<8x2xf32> -> vector<8x2xf32>
    %c0_10 = arith.constant 0 : index
    %c0_11 = arith.constant 0 : index
    %11 = vector.load %arg6[%c0_10, %c0_11] : memref<8x2xf32, #tpu.memory_space<vmem>>, vector<8x2xf32>
    tpu.vector_store %arg6[%c0_10, %c0_11], %10 {strides = array<i32>} : memref<8x2xf32, #tpu.memory_space<vmem>>, vector<8x2xf32>,
    return
  }
  func.func @transform_0(%arg0: i32) -> (i32, i32) {
    %c0_i32 = arith.constant 0 : i32
    %c0_i32_0 = arith.constant 0 : i32
    return %arg0, %c0_i32 : i32, i32
  }
  func.func @transform_1(%arg0: i32) -> (i32, i32) {
    %c0_i32 = arith.constant 0 : i32
    %c0_i32_0 = arith.constant 0 : i32
    %c0_i32_1 = arith.constant 0 : i32
    return %c0_i32, %c0_i32_0 : i32, i32
  }
  func.func @transform_2(%arg0: i32) -> (i32, i32) {
    %c0_i32 = arith.constant 0 : i32
    %c0_i32_0 = arith.constant 0 : i32
    %c0_i32_1 = arith.constant 0 : i32
    return %c0_i32, %c0_i32_0 : i32, i32
  }
  func.func @transform_3(%arg0: i32) -> (i32, i32) {
    %c0_i32 = arith.constant 0 : i32
    %c0_i32_0 = arith.constant 0 : i32
    %c0_i32_1 = arith.constant 0 : i32
    return %c0_i32, %c0_i32_0 : i32, i32
  }
  func.func @transform_4(%arg0: i32) -> (i32, i32) {
    %c0_i32 = arith.constant 0 : i32
    %c0_i32_0 = arith.constant 0 : i32
    return %arg0, %c0_i32 : i32, i32
  }
  func.func @transform_5(%arg0: i32) -> (i32, i32) {
    %c0_i32 = arith.constant 0 : i32
    %c0_i32_0 = arith.constant 0 : i32
    return %arg0, %c0_i32 : i32, i32
  }
}

module attributes {stable_mosaic.version = 11 : i64} {
  func.func @_gat_kernel(%arg0: i32, %arg1: i32, %arg2: memref<128x1xf32, #tpu.memory_space<vmem>>, %arg3: memref<1x128xf32, #tpu.memory_space<vmem>>, %arg4: memref<128x32xbf16, #tpu.memory_space<vmem>>, %arg5: memref<128x128xbf16, #tpu.memory_space<vmem>>, %arg6: memref<1x32xf32, #tpu.memory_space<vmem>>, %arg7: memref<32x8xbf16, #tpu.memory_space<vmem>>, %arg8: memref<1x8xf32, #tpu.memory_space<vmem>>, %arg9: memref<128x32xf32, #tpu.memory_space<vmem>>, %arg10: memref<128x8xf32, #tpu.memory_space<vmem>>, %arg11: memref<128x1xf32, #tpu.memory_space<vmem>>, %arg12: memref<128x1xf32, #tpu.memory_space<vmem>>, %arg13: memref<128x32xf32, #tpu.memory_space<vmem>>) attributes {dimension_semantics = [#tpu.dimension_semantics<parallel>, #tpu.dimension_semantics<arbitrary>], iteration_bounds = array<i64: 1, 1>, scalar_prefetch = 0 : i64, scratch_operands = 3 : i64, tpu.core_type = #tpu.core_type<tc>, window_params = [{transform_indices = @transform_0, window_bounds = array<i64: 128, 1>}, {transform_indices = @transform_1, window_bounds = array<i64: 1, 128>}, {transform_indices = @transform_2, window_bounds = array<i64: 128, 32>}, {transform_indices = @transform_3, window_bounds = array<i64: 128, 128>}, {pipeline_mode = #tpu.pipeline_mode<synchronous>, transform_indices = @transform_4, window_bounds = array<i64: 1, 32>}, {pipeline_mode = #tpu.pipeline_mode<synchronous>, transform_indices = @transform_5, window_bounds = array<i64: 32, 8>}, {pipeline_mode = #tpu.pipeline_mode<synchronous>, transform_indices = @transform_6, window_bounds = array<i64: 1, 8>}, {transform_indices = @transform_7, window_bounds = array<i64: 128, 32>}, {transform_indices = @transform_8, window_bounds = array<i64: 128, 8>}]} {
    %c0_i32 = arith.constant 0 : i32
    %0 = arith.cmpi eq, %arg1, %c0_i32 : i32
    %1 = arith.extui %0 : i1 to i32
    %c0_i32_0 = arith.constant 0 : i32
    %2 = arith.cmpi ne, %1, %c0_i32_0 : i32
    scf.if %2 {
      %cst_31 = arith.constant 0xFF800000 : f32
      %48 = vector.broadcast %cst_31 : f32 to vector<128x1xf32>
      %c0_32 = arith.constant 0 : index
      %c0_33 = arith.constant 0 : index
      %49 = vector.load %arg11[%c0_32, %c0_33] : memref<128x1xf32, #tpu.memory_space<vmem>>, vector<128x1xf32>
      tpu.vector_store %arg11[%c0_32, %c0_33], %48 {strides = array<i32>} : memref<128x1xf32, #tpu.memory_space<vmem>>, vector<128x1xf32>,
      %cst_34 = arith.constant 0.000000e+00 : f32
      %50 = vector.broadcast %cst_34 : f32 to vector<128x1xf32>
      %c0_35 = arith.constant 0 : index
      %c0_36 = arith.constant 0 : index
      %51 = vector.load %arg12[%c0_35, %c0_36] : memref<128x1xf32, #tpu.memory_space<vmem>>, vector<128x1xf32>
      tpu.vector_store %arg12[%c0_35, %c0_36], %50 {strides = array<i32>} : memref<128x1xf32, #tpu.memory_space<vmem>>, vector<128x1xf32>,
      %cst_37 = arith.constant 0.000000e+00 : f32
      %52 = vector.broadcast %cst_37 : f32 to vector<128x32xf32>
      %c0_38 = arith.constant 0 : index
      %c0_39 = arith.constant 0 : index
      %53 = vector.load %arg13[%c0_38, %c0_39] : memref<128x32xf32, #tpu.memory_space<vmem>>, vector<128x32xf32>
      tpu.vector_store %arg13[%c0_38, %c0_39], %52 {strides = array<i32>} : memref<128x32xf32, #tpu.memory_space<vmem>>, vector<128x32xf32>,
    } else {
    }
    %c0 = arith.constant 0 : index
    %c0_1 = arith.constant 0 : index
    %3 = vector.load %arg2[%c0, %c0_1] : memref<128x1xf32, #tpu.memory_space<vmem>>, vector<128x1xf32>
    %c0_2 = arith.constant 0 : index
    %c0_3 = arith.constant 0 : index
    %4 = vector.load %arg3[%c0_2, %c0_3] : memref<1x128xf32, #tpu.memory_space<vmem>>, vector<1x128xf32>
    %5 = vector.broadcast %3 : vector<128x1xf32> to vector<128x128xf32>
    %6 = vector.broadcast %4 : vector<1x128xf32> to vector<128x128xf32>
    %7 = arith.addf %5, %6 : vector<128x128xf32>
    %cst = arith.constant 0.000000e+00 : f32
    %8 = vector.broadcast %cst : f32 to vector<128x128xf32>
    %9 = arith.cmpf ogt, %7, %8 : vector<128x128xf32>
    %cst_4 = arith.constant 2.000000e-01 : f32
    %10 = vector.broadcast %cst_4 : f32 to vector<128x128xf32>
    %11 = arith.mulf %10, %7 : vector<128x128xf32>
    %12 = arith.select %9, %7, %11 : vector<128x128xi1>, vector<128x128xf32>
    %c0_5 = arith.constant 0 : index
    %c0_6 = arith.constant 0 : index
    %13 = vector.load %arg5[%c0_5, %c0_6] : memref<128x128xbf16, #tpu.memory_space<vmem>>, vector<128x128xbf16>
    %cst_7 = arith.constant 0.000000e+00 : bf16
    %14 = vector.broadcast %cst_7 : bf16 to vector<128x128xbf16>
    %15 = arith.cmpf ogt, %13, %14 : vector<128x128xbf16>
    %cst_8 = arith.constant -1.000000e+30 : f32
    %16 = vector.broadcast %cst_8 : f32 to vector<128x128xf32>
    %17 = arith.select %15, %12, %16 : vector<128x128xi1>, vector<128x128xf32>
    %cst_9 = arith.constant dense<0xFF800000> : vector<128xf32>
    %18 = vector.multi_reduction <maximumf>, %17, %cst_9 [1] : vector<128x128xf32> to vector<128xf32>
    %19 = vector.shape_cast %18 : vector<128xf32> to vector<128x1xf32>
    %c0_10 = arith.constant 0 : index
    %c0_11 = arith.constant 0 : index
    %20 = vector.load %arg11[%c0_10, %c0_11] : memref<128x1xf32, #tpu.memory_space<vmem>>, vector<128x1xf32>
    %21 = arith.maximumf %20, %19 : vector<128x1xf32>
    %c0_12 = arith.constant 0 : index
    %c0_13 = arith.constant 0 : index
    %22 = vector.load %arg11[%c0_12, %c0_13] : memref<128x1xf32, #tpu.memory_space<vmem>>, vector<128x1xf32>
    %23 = arith.subf %22, %21 : vector<128x1xf32>
    %24 = math.exp %23 : vector<128x1xf32>
    %25 = vector.broadcast %21 : vector<128x1xf32> to vector<128x128xf32>
    %26 = arith.subf %17, %25 : vector<128x128xf32>
    %27 = math.exp %26 : vector<128x128xf32>
    %cst_14 = arith.constant 0.000000e+00 : f32
    %28 = vector.broadcast %cst_14 : f32 to vector<128x128xf32>
    %29 = arith.select %15, %27, %28 : vector<128x128xi1>, vector<128x128xf32>
    %c0_15 = arith.constant 0 : index
    %c0_16 = arith.constant 0 : index
    %30 = vector.load %arg12[%c0_15, %c0_16] : memref<128x1xf32, #tpu.memory_space<vmem>>, vector<128x1xf32>
    %31 = arith.mulf %24, %30 : vector<128x1xf32>
    %cst_17 = arith.constant dense<0.000000e+00> : vector<128xf32>
    %32 = vector.multi_reduction <add>, %29, %cst_17 [1] : vector<128x128xf32> to vector<128xf32>
    %33 = vector.shape_cast %32 : vector<128xf32> to vector<128x1xf32>
    %34 = arith.addf %31, %33 : vector<128x1xf32>
    %c0_18 = arith.constant 0 : index
    %c0_19 = arith.constant 0 : index
    %35 = vector.load %arg12[%c0_18, %c0_19] : memref<128x1xf32, #tpu.memory_space<vmem>>, vector<128x1xf32>
    tpu.vector_store %arg12[%c0_18, %c0_19], %34 {strides = array<i32>} : memref<128x1xf32, #tpu.memory_space<vmem>>, vector<128x1xf32>,
    %c0_20 = arith.constant 0 : index
    %c0_21 = arith.constant 0 : index
    %36 = vector.load %arg13[%c0_20, %c0_21] : memref<128x32xf32, #tpu.memory_space<vmem>>, vector<128x32xf32>
    %37 = vector.broadcast %24 : vector<128x1xf32> to vector<128x32xf32>
    %38 = arith.mulf %37, %36 : vector<128x32xf32>
    %39 = arith.truncf %29 : vector<128x128xf32> to vector<128x128xbf16>
    %c0_22 = arith.constant 0 : index
    %c0_23 = arith.constant 0 : index
    %40 = vector.load %arg4[%c0_22, %c0_23] : memref<128x32xbf16, #tpu.memory_space<vmem>>, vector<128x32xbf16>
    %cst_24 = arith.constant dense<0.000000e+00> : vector<128x32xf32>
    %41 = tpu.matmul %39, %40, %cst_24 {dimension_numbers = #tpu.dot_dimension_numbers<[1], [0], [0], [1], [0, 0, 1, 1], [], []>} : vector<128x128xbf16>, vector<128x32xbf16>, vector<128x32xf32> -> vector<128x32xf32>
    %42 = arith.addf %38, %41 : vector<128x32xf32>
    %c0_25 = arith.constant 0 : index
    %c0_26 = arith.constant 0 : index
    %43 = vector.load %arg13[%c0_25, %c0_26] : memref<128x32xf32, #tpu.memory_space<vmem>>, vector<128x32xf32>
    tpu.vector_store %arg13[%c0_25, %c0_26], %42 {strides = array<i32>} : memref<128x32xf32, #tpu.memory_space<vmem>>, vector<128x32xf32>,
    %c0_27 = arith.constant 0 : index
    %c0_28 = arith.constant 0 : index
    %44 = vector.load %arg11[%c0_27, %c0_28] : memref<128x1xf32, #tpu.memory_space<vmem>>, vector<128x1xf32>
    tpu.vector_store %arg11[%c0_27, %c0_28], %21 {strides = array<i32>} : memref<128x1xf32, #tpu.memory_space<vmem>>, vector<128x1xf32>,
    %c0_i32_29 = arith.constant 0 : i32
    %45 = arith.cmpi eq, %arg1, %c0_i32_29 : i32
    %46 = arith.extui %45 : i1 to i32
    %c0_i32_30 = arith.constant 0 : i32
    %47 = arith.cmpi ne, %46, %c0_i32_30 : i32
    scf.if %47 {
      %c0_31 = arith.constant 0 : index
      %c0_32 = arith.constant 0 : index
      %48 = vector.load %arg12[%c0_31, %c0_32] : memref<128x1xf32, #tpu.memory_space<vmem>>, vector<128x1xf32>
      %cst_33 = arith.constant 1.000000e-30 : f32
      %49 = vector.broadcast %cst_33 : f32 to vector<128x1xf32>
      %50 = arith.maximumf %48, %49 : vector<128x1xf32>
      %c0_34 = arith.constant 0 : index
      %c0_35 = arith.constant 0 : index
      %51 = vector.load %arg13[%c0_34, %c0_35] : memref<128x32xf32, #tpu.memory_space<vmem>>, vector<128x32xf32>
      %52 = tpu.reciprocal %50 {approx = true} : vector<128x1xf32> -> vector<128x1xf32>
      %53 = vector.broadcast %52 : vector<128x1xf32> to vector<128x32xf32>
      %54 = arith.mulf %51, %53 : vector<128x32xf32>
      %c0_36 = arith.constant 0 : index
      %c0_37 = arith.constant 0 : index
      %55 = vector.load %arg6[%c0_36, %c0_37] : memref<1x32xf32, #tpu.memory_space<vmem>>, vector<1x32xf32>
      %56 = vector.broadcast %55 : vector<1x32xf32> to vector<128x32xf32>
      %57 = arith.addf %54, %56 : vector<128x32xf32>
      %cst_38 = arith.constant 0.000000e+00 : f32
      %58 = vector.broadcast %cst_38 : f32 to vector<128x32xf32>
      %59 = arith.cmpf ogt, %57, %58 : vector<128x32xf32>
      %cst_39 = arith.constant 0.000000e+00 : f32
      %60 = vector.broadcast %cst_39 : f32 to vector<128x32xf32>
      %61 = arith.minimumf %57, %60 : vector<128x32xf32>
      %62 = math.exp %61 : vector<128x32xf32>
      %cst_40 = arith.constant 1.000000e+00 : f32
      %63 = vector.broadcast %cst_40 : f32 to vector<128x32xf32>
      %64 = arith.subf %62, %63 : vector<128x32xf32>
      %65 = arith.select %59, %57, %64 : vector<128x32xi1>, vector<128x32xf32>
      %c0_41 = arith.constant 0 : index
      %c0_42 = arith.constant 0 : index
      %66 = vector.load %arg9[%c0_41, %c0_42] : memref<128x32xf32, #tpu.memory_space<vmem>>, vector<128x32xf32>
      tpu.vector_store %arg9[%c0_41, %c0_42], %65 {strides = array<i32>} : memref<128x32xf32, #tpu.memory_space<vmem>>, vector<128x32xf32>,
      %67 = arith.truncf %65 : vector<128x32xf32> to vector<128x32xbf16>
      %c0_43 = arith.constant 0 : index
      %c0_44 = arith.constant 0 : index
      %68 = vector.load %arg7[%c0_43, %c0_44] : memref<32x8xbf16, #tpu.memory_space<vmem>>, vector<32x8xbf16>
      %cst_45 = arith.constant dense<0.000000e+00> : vector<128x8xf32>
      %69 = tpu.matmul %67, %68, %cst_45 {dimension_numbers = #tpu.dot_dimension_numbers<[1], [0], [0], [1], [0, 0, 1, 1], [], []>} : vector<128x32xbf16>, vector<32x8xbf16>, vector<128x8xf32> -> vector<128x8xf32>
      %c0_46 = arith.constant 0 : index
      %c0_47 = arith.constant 0 : index
      %70 = vector.load %arg8[%c0_46, %c0_47] : memref<1x8xf32, #tpu.memory_space<vmem>>, vector<1x8xf32>
      %71 = vector.broadcast %70 : vector<1x8xf32> to vector<128x8xf32>
      %72 = arith.addf %69, %71 : vector<128x8xf32>
      %c0_48 = arith.constant 0 : index
      %c0_49 = arith.constant 0 : index
      %73 = vector.load %arg10[%c0_48, %c0_49] : memref<128x8xf32, #tpu.memory_space<vmem>>, vector<128x8xf32>
      tpu.vector_store %arg10[%c0_48, %c0_49], %72 {strides = array<i32>} : memref<128x8xf32, #tpu.memory_space<vmem>>, vector<128x8xf32>,
    } else {
    }
    return
  }
  func.func @transform_0(%arg0: i32, %arg1: i32) -> (i32, i32) {
    %c0_i32 = arith.constant 0 : i32
    %c0_i32_0 = arith.constant 0 : i32
    return %arg0, %c0_i32 : i32, i32
  }
  func.func @transform_1(%arg0: i32, %arg1: i32) -> (i32, i32) {
    %c0_i32 = arith.constant 0 : i32
    %c0_i32_0 = arith.constant 0 : i32
    return %c0_i32, %arg1 : i32, i32
  }
  func.func @transform_2(%arg0: i32, %arg1: i32) -> (i32, i32) {
    %c0_i32 = arith.constant 0 : i32
    %c0_i32_0 = arith.constant 0 : i32
    return %arg1, %c0_i32 : i32, i32
  }
  func.func @transform_3(%arg0: i32, %arg1: i32) -> (i32, i32) {
    %c0_i32 = arith.constant 0 : i32
    return %arg0, %arg1 : i32, i32
  }
  func.func @transform_4(%arg0: i32, %arg1: i32) -> (i32, i32) {
    %c0_i32 = arith.constant 0 : i32
    %c0_i32_0 = arith.constant 0 : i32
    %c0_i32_1 = arith.constant 0 : i32
    return %c0_i32, %c0_i32_0 : i32, i32
  }
  func.func @transform_5(%arg0: i32, %arg1: i32) -> (i32, i32) {
    %c0_i32 = arith.constant 0 : i32
    %c0_i32_0 = arith.constant 0 : i32
    %c0_i32_1 = arith.constant 0 : i32
    return %c0_i32, %c0_i32_0 : i32, i32
  }
  func.func @transform_6(%arg0: i32, %arg1: i32) -> (i32, i32) {
    %c0_i32 = arith.constant 0 : i32
    %c0_i32_0 = arith.constant 0 : i32
    %c0_i32_1 = arith.constant 0 : i32
    return %c0_i32, %c0_i32_0 : i32, i32
  }
  func.func @transform_7(%arg0: i32, %arg1: i32) -> (i32, i32) {
    %c0_i32 = arith.constant 0 : i32
    %c0_i32_0 = arith.constant 0 : i32
    return %arg0, %c0_i32 : i32, i32
  }
  func.func @transform_8(%arg0: i32, %arg1: i32) -> (i32, i32) {
    %c0_i32 = arith.constant 0 : i32
    %c0_i32_0 = arith.constant 0 : i32
    return %arg0, %c0_i32 : i32, i32
  }
}

module attributes {stable_mosaic.version = 11 : i64} {
  func.func @_loss_kernel(%arg0: memref<8x32xf32, #tpu.memory_space<vmem>>, %arg1: memref<8x32xf32, #tpu.memory_space<vmem>>, %arg2: memref<8x32xf32, #tpu.memory_space<vmem>>, %arg3: memref<8x32xf32, #tpu.memory_space<vmem>>, %arg4: memref<1x1xf32, #tpu.memory_space<smem>>) attributes {dimension_semantics = [], scalar_prefetch = 0 : i64, scratch_operands = 0 : i64, tpu.core_type = #tpu.core_type<tc>} {
    %c0 = arith.constant 0 : index
    %c0_0 = arith.constant 0 : index
    %0 = vector.load %arg0[%c0, %c0_0] : memref<8x32xf32, #tpu.memory_space<vmem>>, vector<8x32xf32>
    %c0_1 = arith.constant 0 : index
    %c0_2 = arith.constant 0 : index
    %1 = vector.load %arg1[%c0_1, %c0_2] : memref<8x32xf32, #tpu.memory_space<vmem>>, vector<8x32xf32>
    %2 = arith.mulf %0, %1 : vector<8x32xf32>
    %cst = arith.constant 0.000000e+00 : f32
    %3 = vector.broadcast %cst : f32 to vector<8x32xf32>
    %4 = arith.minimumf %2, %3 : vector<8x32xf32>
    %5 = math.absf %2 : vector<8x32xf32>
    %cst_3 = arith.constant 0.000000e+00 : f32
    %6 = vector.broadcast %cst_3 : f32 to vector<8x32xf32>
    %7 = arith.subf %6, %5 : vector<8x32xf32>
    %8 = math.exp %7 : vector<8x32xf32>
    %9 = math.log1p %8 : vector<8x32xf32>
    %10 = arith.subf %4, %9 : vector<8x32xf32>
    %11 = vector.shape_cast %10 : vector<8x32xf32> to vector<1x8x32xf32>
    %cst_4 = arith.constant dense<0xFF800000> : vector<1xf32>
    %12 = vector.multi_reduction <maximumf>, %11, %cst_4 [1, 2] : vector<1x8x32xf32> to vector<1xf32>
    %13 = vector.shape_cast %12 : vector<1xf32> to vector<1x1x1xf32>
    %14 = vector.extract %13[0, 0, 0] : f32 from vector<1x1x1xf32>
    %cst_5 = arith.constant 3.000000e-01 : f32
    %15 = arith.mulf %cst_5, %14 : f32
    %16 = vector.broadcast %15 : f32 to vector<8x32xf32>
    %17 = arith.cmpf ogt, %10, %16 : vector<8x32xf32>
    %cst_6 = arith.constant 0.000000e+00 : f32
    %18 = vector.broadcast %cst_6 : f32 to vector<8x32xf32>
    %19 = arith.select %17, %18, %10 : vector<8x32xi1>, vector<8x32xf32>
    %20 = vector.shape_cast %19 : vector<8x32xf32> to vector<1x8x32xf32>
    %cst_7 = arith.constant dense<0.000000e+00> : vector<1xf32>
    %21 = vector.multi_reduction <add>, %20, %cst_7 [1, 2] : vector<1x8x32xf32> to vector<1xf32>
    %22 = vector.shape_cast %21 : vector<1xf32> to vector<1x1x1xf32>
    %23 = vector.extract %22[0, 0, 0] : f32 from vector<1x1x1xf32>
    %cst_8 = arith.constant 0.000000e+00 : f32
    %24 = arith.subf %cst_8, %23 : f32
    %c0_9 = arith.constant 0 : index
    %c0_10 = arith.constant 0 : index
    %25 = vector.load %arg2[%c0_9, %c0_10] : memref<8x32xf32, #tpu.memory_space<vmem>>, vector<8x32xf32>
    %c0_11 = arith.constant 0 : index
    %c0_12 = arith.constant 0 : index
    %26 = vector.load %arg3[%c0_11, %c0_12] : memref<8x32xf32, #tpu.memory_space<vmem>>, vector<8x32xf32>
    %27 = arith.mulf %25, %26 : vector<8x32xf32>
    %cst_13 = arith.constant 0.000000e+00 : f32
    %28 = vector.broadcast %cst_13 : f32 to vector<8x32xf32>
    %29 = arith.minimumf %27, %28 : vector<8x32xf32>
    %30 = math.absf %27 : vector<8x32xf32>
    %cst_14 = arith.constant 0.000000e+00 : f32
    %31 = vector.broadcast %cst_14 : f32 to vector<8x32xf32>
    %32 = arith.subf %31, %30 : vector<8x32xf32>
    %33 = math.exp %32 : vector<8x32xf32>
    %34 = math.log1p %33 : vector<8x32xf32>
    %35 = arith.subf %29, %34 : vector<8x32xf32>
    %36 = vector.shape_cast %35 : vector<8x32xf32> to vector<1x8x32xf32>
    %cst_15 = arith.constant dense<0xFF800000> : vector<1xf32>
    %37 = vector.multi_reduction <maximumf>, %36, %cst_15 [1, 2] : vector<1x8x32xf32> to vector<1xf32>
    %38 = vector.shape_cast %37 : vector<1xf32> to vector<1x1x1xf32>
    %39 = vector.extract %38[0, 0, 0] : f32 from vector<1x1x1xf32>
    %cst_16 = arith.constant 3.000000e-01 : f32
    %40 = arith.mulf %cst_16, %39 : f32
    %41 = vector.broadcast %40 : f32 to vector<8x32xf32>
    %42 = arith.cmpf ogt, %35, %41 : vector<8x32xf32>
    %cst_17 = arith.constant 0.000000e+00 : f32
    %43 = vector.broadcast %cst_17 : f32 to vector<8x32xf32>
    %44 = arith.select %42, %43, %35 : vector<8x32xi1>, vector<8x32xf32>
    %45 = vector.shape_cast %44 : vector<8x32xf32> to vector<1x8x32xf32>
    %cst_18 = arith.constant dense<0.000000e+00> : vector<1xf32>
    %46 = vector.multi_reduction <add>, %45, %cst_18 [1, 2] : vector<1x8x32xf32> to vector<1xf32>
    %47 = vector.shape_cast %46 : vector<1xf32> to vector<1x1x1xf32>
    %48 = vector.extract %47[0, 0, 0] : f32 from vector<1x1x1xf32>
    %cst_19 = arith.constant 0.000000e+00 : f32
    %49 = arith.subf %cst_19, %48 : f32
    %50 = arith.addf %24, %49 : f32
    %c0_20 = arith.constant 0 : index
    %c0_21 = arith.constant 0 : index
    %51 = memref.load %arg4[%c0_20, %c0_21] : memref<1x1xf32, #tpu.memory_space<smem>>
    memref.store %50, %arg4[%c0_20, %c0_21] : memref<1x1xf32, #tpu.memory_space<smem>>
    return
  }
}

</mosaic_0001>

<bundles_post_ra>
// kernel: hgnnd_forward.5
= control target key start
LH: loop header
LB: loop body
LE: loop exit
PB: predicated region body
PF: predicated region fallthrough
CT: control target
= control target key end

     0   :  { %vm40_vm0 = vcmask 1045504   ;;  %v213_v0 = vmov 0.0   ;;  %vm214_vm1 = vmmov 0   ;;  %v215_v7 = vmov 0.0|0.0   ;;  %s273_s1 = inlined_call_operand.vmem [shape: bf16[12,32], index: 1, kind: input, shape index: {}]   ;;  %s274_s0 = inlined_call_operand.vmem [shape: f32[8,12], index: 0, kind: input, shape index: {}]   ;;  %s275_s3 = inlined_call_operand.vmem [shape: f32[32,2], index: 3, kind: input, shape index: {}]   ;;  %s276_s2 = inlined_call_operand.vmem [shape: f32[1,32], index: 2, kind: input, shape index: {}]   ;;  %s277_s4 = inlined_call_operand.vmem [shape: bf16[8,32], index: 4, kind: output, shape index: {0}]   ;;  %s278_s5 = inlined_call_operand.vmem [shape: f32[8,2], index: 5, kind: output, shape index: {1}]  }
   0x1   :  { %186 = vmatprep.subr.bf16.mxu0 %v213_v0  ;;  %v212_v1 = vld [vmem:[%s273_s1] sm:$0x3f]   ;;  %188 = vmatprep.mubr.msk.bf16.mxu0 %vm214_vm1, %v213_v0  ;;  %v88_v4 = vld [vmem:[%s275_s3 + $0x8] sm:$0xff]  ;;  %vm36_vm2 = vcmask 97280   ;;  %v89_v9 = vld [vmem:[%s275_s3 + $0x10] sm:$0xff]  ;;  %vm91_vm3 = vcmask 261120  }
   0x2   :  { %v20_v2 = vld [vmem:[%s274_s0] sm:$0xff]  ;;  %200 = vmatprep.mubr.msk.f32.mxu1 %vm214_vm1, %v213_v0  ;;  %v42_v5 = vsel %vm40_vm0, %v212_v1, 0  ;;  %203 = vmatprep.subr.bf16.mxu1 %v215_v7  ;;  %v90_v10 = vld [vmem:[%s275_s3 + $0x18] sm:$0xff]  ;;  %vm85_vm4 = vcmask 257024   ;;  %vm165_vm5 = vcmask 15360  }
   0x3   :  { %v87_v3 = vld [vmem:[%s275_s3] sm:$0xff]  ;;  %v21_v6 = vpack.c.bf16 %v20_v2, %v20_v2  ;;  %187 = vmatpush3.bf16.msra.mxu0 %v42_v5  ;;  %v207_v11 = vpack.c.bf16 %v90_v10, %v89_v9 }
   0x4   :  { %v204_v8 = vpack.c.bf16 %v88_v4, %v87_v3  ;;  %v175_v12 = vld [vmem:[%s276_s2] ss:$0 sm:$0xff] }
   0x6   :  { %205 = vmatpush3.bf16.msra.mxu1 %v204_v8  ;;  %189 = vmatmul.mubr.msk.bf16.vlgmr.msra.gmra.mrb[0].mxu0 %vm36_vm2, %v21_v6 }
   0x7   :  { %206 = vmatprep.subr.bf16.mxu1 %v215_v7 }
   0xa   :  { %208 = vmatpush3.bf16.msra.mxu1 %v207_v11 }
  0xd9   :  { %v78_v13 = vpop.f32.mrb[0].mxu0 }
  0xda   :  { %v79_v14 = vadd.f32 %v175_v12, %v78_v13  ;;  %v190_v15 = vpop.f32.mrb[1].mxu0 }
  0xdb   :  { %v81_v16 = vpop.f32.mrb[2].mxu0 }
  0xdc   :  { %v84_v17 = vpack.c.bf16 %v79_v14, %v79_v14  ;;  %v191_v18 = vpop.f32.mrb[3].mxu0  ;;  %201 = vmatmul.mubr.msk.f32.vlgmr.msra.gmra.mrb[0].mxu1 %vm91_vm3, %v79_v14 }
  0xde   :  { %86 = vst.msk [vmem:[%s277_s4] sm:$0xf] %vm85_vm4, %v84_v17 }
 0x1af   :  { %v161_v19 = vpop.f32.mrb[0].mxu1 }
 0x1b0   :  { %166 = vst.msk [vmem:[%s278_s5] sm:$0xff] %vm165_vm5, %v161_v19  ;;  %v202_v20 = vpop.f32.mrb[1].mxu1 }

// kernel: hgnnd_forward.4
= control target key start
LH: loop header
LB: loop body
LE: loop exit
PB: predicated region body
PF: predicated region fallthrough
CT: control target
= control target key end

     0   :  { %vm40_vm0 = vcmask 1044480   ;;  %v213_v0 = vmov 0.0   ;;  %vm214_vm1 = vmmov 0   ;;  %v215_v7 = vmov 0.0|0.0   ;;  %s273_s1 = inlined_call_operand.vmem [shape: bf16[10,32], index: 1, kind: input, shape index: {}]   ;;  %s274_s0 = inlined_call_operand.vmem [shape: f32[8,10], index: 0, kind: input, shape index: {}]   ;;  %s275_s3 = inlined_call_operand.vmem [shape: f32[32,2], index: 3, kind: input, shape index: {}]   ;;  %s276_s2 = inlined_call_operand.vmem [shape: f32[1,32], index: 2, kind: input, shape index: {}]   ;;  %s277_s4 = inlined_call_operand.vmem [shape: bf16[8,32], index: 4, kind: output, shape index: {0}]   ;;  %s278_s5 = inlined_call_operand.vmem [shape: f32[8,2], index: 5, kind: output, shape index: {1}]  }
   0x1   :  { %186 = vmatprep.subr.bf16.mxu0 %v213_v0  ;;  %v212_v1 = vld [vmem:[%s273_s1] sm:$0x1f]   ;;  %188 = vmatprep.mubr.msk.bf16.mxu0 %vm214_vm1, %v213_v0  ;;  %v88_v4 = vld [vmem:[%s275_s3 + $0x8] sm:$0xff]  ;;  %vm36_vm2 = vcmask 80896   ;;  %v89_v9 = vld [vmem:[%s275_s3 + $0x10] sm:$0xff]  ;;  %vm91_vm3 = vcmask 261120  }
   0x2   :  { %v20_v2 = vld [vmem:[%s274_s0] sm:$0xff]  ;;  %200 = vmatprep.mubr.msk.f32.mxu1 %vm214_vm1, %v213_v0  ;;  %v42_v5 = vsel %vm40_vm0, %v212_v1, 0  ;;  %203 = vmatprep.subr.bf16.mxu1 %v215_v7  ;;  %v90_v10 = vld [vmem:[%s275_s3 + $0x18] sm:$0xff]  ;;  %vm85_vm4 = vcmask 257024   ;;  %vm165_vm5 = vcmask 15360  }
   0x3   :  { %v87_v3 = vld [vmem:[%s275_s3] sm:$0xff]  ;;  %v21_v6 = vpack.c.bf16 %v20_v2, %v20_v2  ;;  %187 = vmatpush3.bf16.msra.mxu0 %v42_v5  ;;  %v207_v11 = vpack.c.bf16 %v90_v10, %v89_v9 }
   0x4   :  { %v204_v8 = vpack.c.bf16 %v88_v4, %v87_v3  ;;  %v175_v12 = vld [vmem:[%s276_s2] ss:$0 sm:$0xff] }
   0x6   :  { %205 = vmatpush3.bf16.msra.mxu1 %v204_v8  ;;  %189 = vmatmul.mubr.msk.bf16.vlgmr.msra.gmra.mrb[0].mxu0 %vm36_vm2, %v21_v6 }
   0x7   :  { %206 = vmatprep.subr.bf16.mxu1 %v215_v7 }
   0xa   :  { %208 = vmatpush3.bf16.msra.mxu1 %v207_v11 }
  0xd9   :  { %v78_v13 = vpop.f32.mrb[0].mxu0 }
  0xda   :  { %v79_v14 = vadd.f32 %v175_v12, %v78_v13  ;;  %v190_v15 = vpop.f32.mrb[1].mxu0 }
  0xdb   :  { %v81_v16 = vpop.f32.mrb[2].mxu0 }
  0xdc   :  { %v84_v17 = vpack.c.bf16 %v79_v14, %v79_v14  ;;  %v191_v18 = vpop.f32.mrb[3].mxu0  ;;  %201 = vmatmul.mubr.msk.f32.vlgmr.msra.gmra.mrb[0].mxu1 %vm91_vm3, %v79_v14 }
  0xde   :  { %86 = vst.msk [vmem:[%s277_s4] sm:$0xf] %vm85_vm4, %v84_v17 }
 0x1af   :  { %v161_v19 = vpop.f32.mrb[0].mxu1 }
 0x1b0   :  { %166 = vst.msk [vmem:[%s278_s5] sm:$0xff] %vm165_vm5, %v161_v19  ;;  %v202_v20 = vpop.f32.mrb[1].mxu1 }

// kernel: hgnnd_forward.7
= control target key start
LH: loop header
LB: loop body
LE: loop exit
PB: predicated region body
PF: predicated region fallthrough
CT: control target
= control target key end

     0   :  { %s204_s0 = inlined_call_operand.vmem [shape: f32[8,32], index: 0, kind: input, shape index: {}]   ;;  %s205_s1 = inlined_call_operand.vmem [shape: f32[8,32], index: 1, kind: input, shape index: {}]   ;;  %s206_s2 = inlined_call_operand.vmem [shape: f32[8,32], index: 2, kind: input, shape index: {}]   ;;  %s207_s3 = inlined_call_operand.vmem [shape: f32[8,32], index: 3, kind: input, shape index: {}]   ;;  %s208_s4 = inlined_call_operand.hbm [shape: f32[1,1], index: 4, kind: output, shape index: {}]  }
   0x1   :  { %v18_v0 = vld [vmem:[%s204_s0] sm:$0xff] }
   0x2   :  { %v19_v1 = vld [vmem:[%s205_s1] sm:$0xff] }
   0x3   :  { %9 = vsyncpa [#allocation3], 0  ;;  %v20_v2 = vmul.f32 %v19_v1, %v18_v0  ;;  %vm36_vm1 = vcmask 261120   ;;  %v62_v18 = vld [vmem:[%s206_s2] sm:$0xff]  ;;  %s138_s30 = scalar_lea.hbm %s208_s4, 16 }
   0x4   :  { %v63_v19 = vld [vmem:[%s207_s3] sm:$0xff]  ;;  %p139_p0 = scmp.ne.s32.totalorder %s208_s4, %s138_s30  ;;  %p142_p1 = scmp.lt.u32.totalorder %s138_s30, %s208_s4 }
   0x5   :  { %v22_v3 = vand.u32 2147483647, %v20_v2  ;;  %v21_v13 = vmin.f32 %v20_v2, 0.0  ;;  %v64_v20 = vmul.f32 %v63_v19, %v62_v18 }
   0x6   :  { %p144_p2 = pnand %p142_p1, %p139_p0 }
   0x7   :  { %v23_v4 = vsub.f32 0.0, %v22_v3  ;;  %v66_v21 = vand.u32 2147483647, %v64_v20  ;;  %v65_v32 = vmin.f32 %v64_v20, 0.0 }
   0x9   :  { %v24_v5 = vmul.f32 1.442695, %v23_v4  ;;  %v67_v22 = vsub.f32 0.0, %v66_v21 }
   0xb   :  { %130 = vpow2.f32 %v24_v5  ;;  %v68_v23 = vmul.f32 1.442695, %v67_v22 }
  0x15   :  { %v131_v6 = vpop.eup %130 }
  0x16   :  { %v26_v7 = vadd.f32 1.0, %v131_v6  ;;  %v29_v8 = vmul.f32 -0.5, %v131_v6  ;;  %v32_v10 = vand.u32 2147483647, %v131_v6 }
  0x18   :  { %132 = vlog2.f32 %v26_v7  ;;  %v30_v9 = vadd.f32 1.0, %v29_v8  ;;  %vm33_vm0 = vcmp.lt.f32.partialorder %v32_v10, 0.0004427343 }
  0x19   :  { %134 = vpow2.f32 %v68_v23 }
  0x1a   :  { %v31_v11 = vmul.f32 %v131_v6, %v30_v9 }
  0x22   :  { %v133_v12 = vpop.eup %132 }
  0x23   :  { %v28_v14 = vmul.f32 0.6931472, %v133_v12  ;;  %v135_v24 = vpop.eup %134 }
  0x24   :  { %v70_v25 = vadd.f32 1.0, %v135_v24  ;;  %v73_v26 = vmul.f32 -0.5, %v135_v24  ;;  %v76_v29 = vand.u32 2147483647, %v135_v24 }
  0x25   :  { %v34_v15 = vsel %vm33_vm0, %v31_v11, %v28_v14 }
  0x26   :  { %v35_v16 = vsub.f32 %v21_v13, %v34_v15  ;;  %136 = vlog2.f32 %v70_v25  ;;  %v74_v27 = vadd.f32 1.0, %v73_v26  ;;  %vm77_vm2 = vcmp.lt.f32.partialorder %v76_v29, 0.0004427343 }
  0x28   :  { %v37_v17 = vsel %vm36_vm1, %v35_v16, -inf  ;;  %v75_v31 = vmul.f32 %v135_v24, %v74_v27 }
  0x29   :  { %38 = vmax.xlane.f32.xlu0 %v37_v17 }
  0x30   :  { %v137_v28 = vpop.eup %136 }
  0x31   :  { %v72_v30 = vmul.f32 0.6931472, %v137_v28 }
  0x33   :  { %v78_v33 = vsel %vm77_vm2, %v75_v31, %v72_v30 }
  0x34   :  { %v79_v34 = vsub.f32 %v65_v32, %v78_v33 }
  0x36   :  { %v80_v35 = vsel %vm36_vm1, %v79_v34, -inf }
  0x37   :  { %81 = vmax.xlane.f32.xlu1 %v80_v35 }
  0xb6   :  { %v39_v36 = vpop.xlane.xlu0 %38 }
  0xb7   :  { %v40_v37 = vrot.slane %v39_v36, 4 }
  0xb9   :  { %v41_v38 = vmax.f32 %v39_v36, %v40_v37 }
  0xbb   :  { %v42_v39 = vrot.slane %v41_v38, 2 }
  0xbd   :  { %v43_v40 = vmax.f32 %v41_v38, %v42_v39 }
  0xbf   :  { %v44_v41 = vrot.slane %v43_v40, 1 }
  0xc1   :  { %v45_v42 = vmax.f32 %v43_v40, %v44_v41 }
  0xc3   :  { %121 = vpush %v45_v42 }
  0xc4   :  { %v82_v46 = vpop.xlane.xlu1 %81 }
  0xc5   :  { %v83_v47 = vrot.slane %v82_v46, 4 }
  0xc7   :  { %v84_v48 = vmax.f32 %v82_v46, %v83_v47 }
  0xc9   :  { %v85_v49 = vrot.slane %v84_v48, 2 }
  0xcb   :  { %v86_v53 = vmax.f32 %v84_v48, %v85_v49 }
  0xcd   :  { %v87_v56 = vrot.slane %v86_v53, 1 }
  0xcf   :  { %v88_v59 = vmax.f32 %v86_v53, %v87_v56 }
  0xf4   :  { %s122_s2 = spop %121 }
  0xf5   :  { %s47_s3 = smul.f32 0.3, %s122_s2 }
  0xf7   :  { %v48_v43 = vstv %s47_s3 }
  0xf8   :  { %vm49_vm3 = vcmp.gt.f32.partialorder %v35_v16, %v48_v43 }
  0xf9   :  { %v50_v44 = vsel %vm49_vm3, 0.0, %v35_v16 }
  0xfa   :  { %v51_v45 = vsel %vm36_vm1, %v50_v44, 0.0 }
  0xfb   :  { %52 = vadd.xlane.f32.xlu0 %v51_v45 }
 0x188   :  { %v53_v50 = vpop.xlane.xlu0 %52 }
 0x189   :  { %v54_v51 = vrot.slane %v53_v50, 4 }
 0x18b   :  { %v55_v52 = vadd.f32 %v54_v51, %v53_v50 }
 0x18d   :  { %v56_v54 = vrot.slane %v55_v52, 2 }
 0x18f   :  { %v57_v55 = vadd.f32 %v56_v54, %v55_v52 }
 0x191   :  { %v58_v57 = vrot.slane %v57_v55, 1 }
 0x193   :  { %v59_v58 = vadd.f32 %v58_v57, %v57_v55 }
 0x195   :  { %123 = vpush %v59_v58 }
 0x196   :  { %125 = vpush %v88_v59 }
 0x1c6   :  { %s124_s21 = spop %123 }
 0x1c7   :  { %s126_s22 = spop %125  ;;  %s61_s24 = ssub.f32 0.0, %s124_s21 }
 0x1c8   :  { %s90_s23 = smul.f32 0.3, %s126_s22 }
 0x1ca   :  { %v91_v60 = vstv %s90_s23 }
 0x1cb   :  { %vm92_vm4 = vcmp.gt.f32.partialorder %v79_v34, %v91_v60 }
 0x1cc   :  { %v93_v61 = vsel %vm92_vm4, 0.0, %v79_v34 }
 0x1cd   :  { %v94_v62 = vsel %vm36_vm1, %v93_v61, 0.0 }
 0x1ce   :  { %95 = vadd.xlane.f32.xlu1 %v94_v62 }
 0x25b   :  { %v96_v63 = vpop.xlane.xlu1 %95 }
 0x25c   :  { %v97_v0 = vrot.slane %v96_v63, 4 }
 0x25e   :  { %v98_v1 = vadd.f32 %v97_v0, %v96_v63 }
 0x260   :  { %v99_v2 = vrot.slane %v98_v1, 2 }
 0x262   :  { %v100_v3 = vadd.f32 %v99_v2, %v98_v1 }
 0x264   :  { %v101_v4 = vrot.slane %v100_v3, 1 }
 0x266   :  { %v102_v5 = vadd.f32 %v101_v4, %v100_v3 }
 0x268   :  { %127 = vpush %v102_v5 }
 0x299   :  { %s128_s25 = spop %127 }
 0x29a   :  { %s104_s26 = ssub.f32 0.0, %s128_s25 }
 0x29c   :  { %s105_s27 = sadd.f32 %s104_s26, %s61_s24 }
 0x29e   :  { %107 = sst [smem:[#allocation2]] %s105_s27 }
 0x29f   :  { %147 = shalt.err (!%p144_p2)
}
 0x2a0   :  { %s150_s9 = smov [#allocation2]  }
 0x2a1   :  { %115 = dma.smem_to_hbm %s150_s9, 16, %s208_s4, [#allocation3]  }
 0x2a2   :  { %148 = dma.done.wait [#allocation3], 16  }
 0x2a3   :  { %149 = vsyncadd [#allocation3], 4294967280 }
 0x2a4   :  { %119 = sfence }
 0x2a5   :  { %120 = vsyncpa [#allocation3], 1 }

// kernel: hgnnd_forward.6
= control target key start
LH: loop header
LB: loop body
LE: loop exit
PB: predicated region body
PF: predicated region fallthrough
CT: control target
= control target key end

     0   :  { %v1788_v0 = vmov 0   ;;  %vm2840_vm0 = vcmask 7168   ;;  %v1789_v17 = vmov -inf   ;;  %s2831_s0 = inlined_call_operand.vmem [shape: f32[128,1], index: 0, kind: input, shape index: {}]   ;;  %s2832_s3 = inlined_call_operand.vmem [shape: bf16[128,128], index: 3, kind: input, shape index: {}]   ;;  %s2833_s1 = inlined_call_operand.vmem [shape: f32[1,128], index: 1, kind: input, shape index: {}]   ;;  %s2834_s2 = inlined_call_operand.vmem [shape: bf16[128,32], index: 2, kind: input, shape index: {}]   ;;  %s2835_s5 = inlined_call_operand.vmem [shape: bf16[32,8], index: 5, kind: input, shape index: {}]   ;;  %s2836_s4 = inlined_call_operand.vmem [shape: f32[1,32], index: 4, kind: input, shape index: {}]   ;;  %s2837_s7 = inlined_call_operand.vmem [shape: f32[128,32], index: 7, kind: output, shape index: {0}]   ;;  %s2838_s6 = inlined_call_operand.vmem [shape: f32[1,8], index: 6, kind: input, shape index: {}]   ;;  %s2839_s8 = inlined_call_operand.vmem [shape: f32[128,8], index: 8, kind: output, shape index: {1}]  }
   0x1   :  { %1649 = vset.pattern.permute.xlu1 %v1788_v0  ;;  %1648 = vset.pattern.permute.xlu0 %v1788_v0  ;;  %v87_v1 = vld [vmem:[%s2831_s0 + $0x10] sm:$0xff]  ;;  %v85_v2 = vld [vmem:[%s2831_s0] sm:$0xff]  ;;  %v88_v3 = vld [vmem:[%s2831_s0 + $0x18] sm:$0xff]  ;;  %36 = vst.msk [vmem:[#allocation2] sm:$0xff] %vm2840_vm0, %v1789_v17 }
   0x2   :  { %114 = vperm.xlu1 %1649, %v87_v1   ;;  %104 = vperm.xlu0 %1648, %v85_v2   ;;  %v86_v4 = vld [vmem:[%s2831_s0 + $0x8] sm:$0xff]  ;;  %v89_v6 = vld [vmem:[%s2831_s0 + $0x20] sm:$0xff]  ;;  %v92_v7 = vld [vmem:[%s2831_s0 + $0x38] sm:$0xff]  ;;  %37 = vst.msk [vmem:[#allocation2 + $0x8] sm:$0xff] %vm2840_vm0, %v1789_v17 }
   0x3   :  { %v90_v5 = vld [vmem:[%s2831_s0 + $0x28] sm:$0xff]  ;;  %v91_v8 = vld [vmem:[%s2831_s0 + $0x30] sm:$0xff]  ;;  %v93_v10 = vld [vmem:[%s2831_s0 + $0x40] sm:$0xff]  ;;  %38 = vst.msk [vmem:[#allocation2 + $0x10] sm:$0xff] %vm2840_vm0, %v1789_v17 }
   0x4   :  { %v94_v9 = vld [vmem:[%s2831_s0 + $0x48] sm:$0xff]  ;;  %v96_v11 = vld [vmem:[%s2831_s0 + $0x58] sm:$0xff]  ;;  %v95_v12 = vld [vmem:[%s2831_s0 + $0x50] sm:$0xff]  ;;  %39 = vst.msk [vmem:[#allocation2 + $0x18] sm:$0xff] %vm2840_vm0, %v1789_v17 }
   0x5   :  { %v98_v13 = vld [vmem:[%s2831_s0 + $0x68] sm:$0xff]  ;;  %v97_v14 = vld [vmem:[%s2831_s0 + $0x60] sm:$0xff]  ;;  %v100_v15 = vld [vmem:[%s2831_s0 + $0x78] sm:$0xff]  ;;  %40 = vst.msk [vmem:[#allocation2 + $0x20] sm:$0xff] %vm2840_vm0, %v1789_v17 }
   0x6   :  { %119 = vperm.xlu1 %1649, %v88_v3   ;;  %109 = vperm.xlu0 %1648, %v86_v4   ;;  %v99_v16 = vld [vmem:[%s2831_s0 + $0x70] sm:$0xff]  ;;  %41 = vst.msk [vmem:[#allocation2 + $0x28] sm:$0xff] %vm2840_vm0, %v1789_v17  ;;  %42 = vst.msk [vmem:[#allocation2 + $0x30] sm:$0xff] %vm2840_vm0, %v1789_v17  ;;  %v252_v18 = vld [vmem:[%s2832_s3] sm:$0xf] }
   0x7   :  { %43 = vst.msk [vmem:[#allocation2 + $0x38] sm:$0xff] %vm2840_vm0, %v1789_v17  ;;  %44 = vst.msk [vmem:[#allocation2 + $0x40] sm:$0xff] %vm2840_vm0, %v1789_v17  ;;  %v254_v19 = vld [vmem:[%s2832_s3 + $0x8] sm:$0xf]  ;;  %v253_v20 = vld [vmem:[%s2832_s3 + $0x4] sm:$0xf] }
   0x8   :  { %45 = vst.msk [vmem:[#allocation2 + $0x48] sm:$0xff] %vm2840_vm0, %v1789_v17  ;;  %46 = vst.msk [vmem:[#allocation2 + $0x50] sm:$0xff] %vm2840_vm0, %v1789_v17  ;;  %vm268_vm1 = vcmp.gt.bf16.partialorder %v252_v18, 0  ;;  %vm270_vm2 = vcmp.gt.bf16.partialorder %v254_v19, 0  ;;  %v255_v21 = vld [vmem:[%s2832_s3 + $0xc] sm:$0xf] }
   0x9   :  { %47 = vst.msk [vmem:[#allocation2 + $0x58] sm:$0xff] %vm2840_vm0, %v1789_v17  ;;  %48 = vst.msk [vmem:[#allocation2 + $0x60] sm:$0xff] %vm2840_vm0, %v1789_v17  ;;  %vm269_vm3 = vcmp.gt.bf16.partialorder %v253_v20, 0  ;;  %v284_v22 = vsel %vm268_vm1, 65537, %v1788_v0  ;;  %v286_v23 = vsel %vm270_vm2, 65537, %v1788_v0  ;;  %vm271_vm4 = vcmp.gt.bf16.partialorder %v255_v21, 0 }
   0xa   :  { %129 = vperm.xlu1 %1649, %v90_v5   ;;  %124 = vperm.xlu0 %1648, %v89_v6   ;;  %49 = vst.msk [vmem:[#allocation2 + $0x68] sm:$0xff] %vm2840_vm0, %v1789_v17  ;;  %50 = vst.msk [vmem:[#allocation2 + $0x70] sm:$0xff] %vm2840_vm0, %v1789_v17  ;;  %v256_v24 = vld [vmem:[%s2832_s3 + $0x10] sm:$0xf]  ;;  %v285_v25 = vsel %vm269_vm3, 65537, %v1788_v0  ;;  %v300_v28 = vunpack.c.l.b16 %v284_v22  ;;  %v302_v29 = vunpack.c.l.b16 %v286_v23  ;;  %v287_v31 = vsel %vm271_vm4, 65537, %v1788_v0 }
   0xb   :  { %51 = vst.msk [vmem:[#allocation2 + $0x78] sm:$0xff] %vm2840_vm0, %v1789_v17  ;;  %v257_v26 = vld [vmem:[%s2832_s3 + $0x14] sm:$0xf]  ;;  %v258_v27 = vld [vmem:[%s2832_s3 + $0x18] sm:$0xf]  ;;  %vm272_vm5 = vcmp.gt.bf16.partialorder %v256_v24, 0  ;;  %v301_v33 = vunpack.c.l.b16 %v285_v25  ;;  %v303_v40 = vunpack.c.l.b16 %v287_v31 }
   0xc   :  { %v259_v30 = vld [vmem:[%s2832_s3 + $0x1c] sm:$0xf]  ;;  %v1933_v32 = vld [vmem:[%s2833_s1] ss:$0 sm:$0xff]  ;;  %vm273_vm6 = vcmp.gt.bf16.partialorder %v257_v26, 0  ;;  %vm274_vm7 = vcmp.gt.bf16.partialorder %v258_v27, 0 }
   0xd   :  { %v288_v34 = vsel %vm272_vm5, 65537, %v1788_v0  ;;  %vm275_vm8 = vcmp.gt.bf16.partialorder %v259_v30, 0  ;;  %v260_v35 = vld [vmem:[%s2832_s3 + $0x20] sm:$0xf]  ;;  %vm1939_vm9 = vcmp.ne.s32.totalorder %v300_v28, 0  ;;  %vm1943_vm10 = vcmp.ne.s32.totalorder %v302_v29, 0 }
   0xe   :  { %139 = vperm.xlu1 %1649, %v92_v7   ;;  %134 = vperm.xlu0 %1648, %v91_v8   ;;  %v261_v41 = vld [vmem:[%s2832_s3 + $0x24] sm:$0xf]  ;;  %v289_v44 = vsel %vm273_vm6, 65537, %v1788_v0  ;;  %v290_v45 = vsel %vm274_vm7, 65537, %v1788_v0  ;;  %vm1954_vm11 = vcmp.ne.s32.totalorder %v301_v33, 0  ;;  %v304_v47 = vunpack.c.l.b16 %v288_v34 }
   0xf   :  { %v291_v48 = vsel %vm275_vm8, 65537, %v1788_v0  ;;  %vm276_vm12 = vcmp.gt.bf16.partialorder %v260_v35, 0  ;;  %vm277_vm14 = vcmp.gt.bf16.partialorder %v261_v41, 0  ;;  %vm1959_vm1 = vcmp.ne.s32.totalorder %v303_v40, 0  ;;  %v262_v1 = vld [vmem:[%s2832_s3 + $0x28] sm:$0xf] }
  0x10   :  { %v305_v54 = vunpack.c.l.b16 %v289_v44  ;;  %v306_v55 = vunpack.c.l.b16 %v290_v45  ;;  %v292_v59 = vsel %vm276_vm12, 65537, %v1788_v0  ;;  %vm1970_vm2 = vcmp.ne.s32.totalorder %v304_v47, 0  ;;  %v264_v17 = vld [vmem:[%s2832_s3 + $0x30] sm:$0xf]  ;;  %v265_v29 = vld [vmem:[%s2832_s3 + $0x34] sm:$0xf] }
  0x11   :  { %v307_v62 = vunpack.c.l.b16 %v291_v48  ;;  %v293_v63 = vsel %vm277_vm14, 65537, %v1788_v0  ;;  %v2883_v8 = vmov 0  ;;  %vm278_vm7 = vcmp.gt.bf16.partialorder %v262_v1, 0  ;;  %v266_v33 = vld [vmem:[%s2832_s3 + $0x38] sm:$0xf] }
  0x12   :  { %149 = vperm.xlu1 %1649, %v94_v9   ;;  %144 = vperm.xlu0 %1648, %v93_v10   ;;  %vm1980_vm5 = vcmp.ne.s32.totalorder %v305_v54, 0  ;;  %vm1984_vm6 = vcmp.ne.s32.totalorder %v306_v55, 0  ;;  %v308_v9 = vunpack.c.l.b16 %v292_v59  ;;  %v2885_v21 = vmov 0  ;;  %v267_v48 = vld [vmem:[%s2832_s3 + $0x3c] sm:$0xf] }
  0x13   :  { %v2884_v8 = vsel %vm1984_vm6, 4294967295, %v2883_v8  ;;  %vm2007_vm12 = vcmp.ne.s32.totalorder %v307_v62, 0  ;;  %v2887_v24 = vmov 0  ;;  %v294_v25 = vsel %vm278_vm7, 65537, %v1788_v0 }
  0x14   :  { %v2886_v21 = vsel %vm2007_vm12, 4294967295, %v2885_v21  ;;  %vm2011_vm14 = vcmp.ne.s32.totalorder %v308_v9, 0  ;;  %v2889_v41 = vmov 0 }
  0x15   :  { %v2888_v24 = vsel %vm2011_vm14, 4294967295, %v2887_v24 }
  0x16   :  { %159 = vperm.xlu1 %1649, %v96_v11   ;;  %154 = vperm.xlu0 %1648, %v95_v12  }
  0x1a   :  { %169 = vperm.xlu1 %1649, %v98_v13   ;;  %164 = vperm.xlu0 %1648, %v97_v14   ;;  %v263_v13 = vld [vmem:[%s2832_s3 + $0x2c] sm:$0xf] }
  0x1e   :  { %179 = vperm.xlu1 %1649, %v100_v15   ;;  %174 = vperm.xlu0 %1648, %v99_v16   ;;  %v309_v16 = vunpack.c.l.b16 %v293_v63 }
  0x81   :  { %v115_v36 = vpop.permute.xlu1 %114  ;;  %v105_v37 = vpop.permute.xlu0 %104 }
  0x82   :  { %v190_v42 = vadd.f32 %v1933_v32, %v115_v36  ;;  %v188_v43 = vadd.f32 %v1933_v32, %v105_v37 }
  0x84   :  { %v222_v49 = vmul.f32 0.2, %v190_v42  ;;  %v220_v50 = vmul.f32 0.2, %v188_v43  ;;  %vm204_vm13 = vcmp.gt.f32.partialorder %v188_v43, 0.0  ;;  %vm206_vm15 = vcmp.gt.f32.partialorder %v190_v42, 0.0 }
  0x85   :  { %v120_v51 = vpop.permute.xlu1 %119  ;;  %v110_v52 = vpop.permute.xlu0 %109 }
  0x86   :  { %v191_v56 = vadd.f32 %v1933_v32, %v120_v51  ;;  %v189_v57 = vadd.f32 %v1933_v32, %v110_v52  ;;  %v236_v58 = vsel %vm204_vm13, %v188_v43, %v220_v50  ;;  %v238_v4 = vsel %vm206_vm15, %v190_v42, %v222_v49 }
  0x87   :  { %v1968_v60 = vsel %vm1939_vm9, %v236_v58, -1e+30  ;;  %v1995_v14 = vsel %vm1943_vm10, %v238_v4, -1e+30  ;;  %vm279_vm15 = vcmp.gt.bf16.partialorder %v263_v13, 0  ;;  %v310_v42 = vunpack.c.l.b16 %v294_v25 }
  0x88   :  { %v223_v2 = vmul.f32 0.2, %v191_v56  ;;  %v221_v3 = vmul.f32 0.2, %v189_v57  ;;  %348 = vmax.xlane.f32.xlu0 %v1968_v60  ;;  %vm205_vm3 = vcmp.gt.f32.partialorder %v189_v57, 0.0  ;;  %vm207_vm4 = vcmp.gt.f32.partialorder %v191_v56, 0.0 }
  0x89   :  { %v130_v5 = vpop.permute.xlu1 %129  ;;  %v125_v6 = vpop.permute.xlu0 %124  ;;  %v295_v43 = vsel %vm279_vm15, 65537, %v1788_v0  ;;  %vm2060_vm0 = vcmp.ne.s32.totalorder %v310_v42, 0  ;;  %v2891_v58 = vmov 0 }
  0x8a   :  { %v193_v10 = vadd.f32 %v1933_v32, %v130_v5  ;;  %v192_v11 = vadd.f32 %v1933_v32, %v125_v6  ;;  %v237_v12 = vsel %vm205_vm3, %v189_v57, %v221_v3  ;;  %v239_v20 = vsel %vm207_vm4, %v191_v56, %v223_v2 }
  0x8b   :  { %v1999_v15 = vsel %vm1954_vm11, %v237_v12, -1e+30  ;;  %vm280_vm3 = vcmp.gt.bf16.partialorder %v264_v17, 0  ;;  %v2024_v30 = vsel %vm1959_vm1, %v239_v20, -1e+30  ;;  %v2892_v58 = vsel %vm2060_vm0, 4294967295, %v2891_v58 }
  0x8c   :  { %v225_v18 = vmul.f32 0.2, %v193_v10  ;;  %v224_v19 = vmul.f32 0.2, %v192_v11  ;;  %352 = vmax.xlane.f32.xlu0 %v1995_v14  ;;  %350 = vmax.xlane.f32.xlu1 %v1999_v15  ;;  %vm208_vm8 = vcmp.gt.f32.partialorder %v192_v11, 0.0  ;;  %vm209_vm13 = vcmp.gt.f32.partialorder %v193_v10, 0.0 }
  0x8d   :  { %v140_v22 = vpop.permute.xlu1 %139  ;;  %v135_v23 = vpop.permute.xlu0 %134  ;;  %v296_v51 = vsel %vm280_vm3, 65537, %v1788_v0  ;;  %v311_v59 = vunpack.c.l.b16 %v295_v43  ;;  %vm2893_vm3 = vcmp.gt.bf16.partialorder %v265_v29, 0 }
  0x8e   :  { %v195_v26 = vadd.f32 %v1933_v32, %v140_v22  ;;  %v194_v27 = vadd.f32 %v1933_v32, %v135_v23  ;;  %v240_v28 = vsel %vm208_vm8, %v192_v11, %v224_v19  ;;  %v241_v36 = vsel %vm209_vm13, %v193_v10, %v225_v18 }
  0x8f   :  { %v2028_v31 = vsel %vm1970_vm2, %v240_v28, -1e+30  ;;  %vm2036_vm8 = vcmp.ne.s32.totalorder %v309_v16, 0  ;;  %v2049_v49 = vsel %vm1980_vm5, %v241_v36, -1e+30  ;;  %vm282_vm13 = vcmp.gt.bf16.partialorder %v266_v33, 0 }
  0x90   :  { %v227_v34 = vmul.f32 0.2, %v195_v26  ;;  %v226_v35 = vmul.f32 0.2, %v194_v27  ;;  %354 = vmax.xlane.f32.xlu0 %v2024_v30  ;;  %356 = vmax.xlane.f32.xlu1 %v2028_v31  ;;  %vm210_vm4 = vcmp.gt.f32.partialorder %v194_v27, 0.0  ;;  %vm211_vm7 = vcmp.gt.f32.partialorder %v195_v26, 0.0 }
  0x91   :  { %v150_v37 = vpop.permute.xlu1 %149  ;;  %v145_v40 = vpop.permute.xlu0 %144  ;;  %v2890_v41 = vsel %vm2036_vm8, 4294967295, %v2889_v41  ;;  %v297_v62 = vsel %vm2893_vm3, 65537, %v1788_v0  ;;  %v312_v3 = vunpack.c.l.b16 %v296_v51  ;;  %v298_v6 = vsel %vm282_vm13, 65537, %v1788_v0 }
  0x92   :  { %v197_v44 = vadd.f32 %v1933_v32, %v150_v37  ;;  %v196_v45 = vadd.f32 %v1933_v32, %v145_v40  ;;  %v242_v47 = vsel %vm210_vm4, %v194_v27, %v226_v35  ;;  %v243_v55 = vsel %vm211_vm7, %v195_v26, %v227_v34 }
  0x93   :  { %v2053_v50 = vsel %vm1984_vm6, %v242_v47, -1e+30  ;;  %v2070_v4 = vsel %vm2007_vm12, %v243_v55, -1e+30  ;;  %vm283_vm7 = vcmp.gt.bf16.partialorder %v267_v48, 0  ;;  %vm2081_vm12 = vcmp.ne.s32.totalorder %v311_v59, 0 }
  0x94   :  { %v229_v52 = vmul.f32 0.2, %v197_v44  ;;  %v228_v54 = vmul.f32 0.2, %v196_v45  ;;  %358 = vmax.xlane.f32.xlu0 %v2049_v49  ;;  %360 = vmax.xlane.f32.xlu1 %v2053_v50  ;;  %vm212_vm15 = vcmp.gt.f32.partialorder %v196_v45, 0.0  ;;  %vm213_vm4 = vcmp.gt.f32.partialorder %v197_v44, 0.0 }
  0x95   :  { %v160_v56 = vpop.permute.xlu1 %159  ;;  %v155_v57 = vpop.permute.xlu0 %154  ;;  %v2894_v16 = vmov 0  ;;  %v313_v17 = vunpack.c.l.b16 %v297_v62  ;;  %vm2087_vm13 = vcmp.ne.s32.totalorder %v312_v3, 0  ;;  %v2896_v22 = vmov 0  ;;  %v1650_v62 = vld [vmem:[%s2834_s2] sm:$0xff]  }
  0x96   :  { %v199_v63 = vadd.f32 %v1933_v32, %v160_v56  ;;  %v198_v1 = vadd.f32 %v1933_v32, %v155_v57  ;;  %v244_v2 = vsel %vm212_vm15, %v196_v45, %v228_v54  ;;  %v245_v11 = vsel %vm213_vm4, %v197_v44, %v229_v52  ;;  %1593 = vmatprep.subr.bf16.mxu0 %v1650_v62 }
  0x97   :  { %v2074_v5 = vsel %vm2011_vm14, %v244_v2, -1e+30  ;;  %v2895_v16 = vsel %vm2081_vm12, 4294967295, %v2894_v16  ;;  %v2897_v22 = vsel %vm2087_vm13, 4294967295, %v2896_v22  ;;  %v2093_v23 = vsel %vm2036_vm8, %v245_v11, -1e+30  ;;  %1594 = vmatpush3.bf16.msra.mxu0 %v1650_v62 }
  0x98   :  { %v231_v9 = vmul.f32 0.2, %v199_v63  ;;  %v230_v10 = vmul.f32 0.2, %v198_v1  ;;  %362 = vmax.xlane.f32.xlu0 %v2070_v4  ;;  %364 = vmax.xlane.f32.xlu1 %v2074_v5  ;;  %vm214_vm15 = vcmp.gt.f32.partialorder %v198_v1, 0.0  ;;  %vm215_vm3 = vcmp.gt.f32.partialorder %v199_v63, 0.0 }
  0x99   :  { %v170_v12 = vpop.permute.xlu1 %169  ;;  %v165_v13 = vpop.permute.xlu0 %164  ;;  %v314_v26 = vunpack.c.l.b16 %v298_v6  ;;  %v299_v27 = vsel %vm283_vm7, 65537, %v1788_v0  ;;  %v2855_v52 = vmov 0.0   ;;  %v2186_v6 = vld [vmem:[#allocation2 + $0x8] sm:$0xff]  ;;  %v1652_v11 = vld [vmem:[%s2834_s2 + $0x10] sm:$0xff]   ;;  %v2250_v62 = vld [vmem:[#allocation2 + $0x40] sm:$0xff]  ;;  %v2958_v57 = vmov 0.0  }
  0x9a   :  { %v201_v18 = vadd.f32 %v1933_v32, %v170_v12  ;;  %v200_v19 = vadd.f32 %v1933_v32, %v165_v13  ;;  %v246_v20 = vsel %vm214_vm15, %v198_v1, %v230_v10  ;;  %v247_v33 = vsel %vm215_vm3, %v199_v63, %v231_v9  ;;  %v1651_v63 = vld [vmem:[%s2834_s2 + $0x8] sm:$0xff]   ;;  %v2181_v1 = vld [vmem:[#allocation2] sm:$0xff]  ;;  %v2188_v9 = vld [vmem:[#allocation2 + $0x10] sm:$0xff] }
  0x9b   :  { %v2097_v25 = vsel %vm2060_vm0, %v246_v20, -1e+30  ;;  %vm2105_vm0 = vcmp.ne.s32.totalorder %v313_v17, 0  ;;  %v2111_v0 = vsel %vm2081_vm12, %v247_v33, -1e+30  ;;  %vm2117_vm7 = vcmp.ne.s32.totalorder %v314_v26, 0  ;;  %1595 = vmatprep.subr.bf16.mxu0 %v1651_v63 }
  0x9c   :  { %v233_v28 = vmul.f32 0.2, %v201_v18  ;;  %v232_v29 = vmul.f32 0.2, %v200_v19  ;;  %366 = vmax.xlane.f32.xlu0 %v2093_v23  ;;  %368 = vmax.xlane.f32.xlu1 %v2097_v25  ;;  %vm216_vm4 = vcmp.gt.f32.partialorder %v200_v19, 0.0  ;;  %vm217_vm15 = vcmp.gt.f32.partialorder %v201_v18, 0.0 }
  0x9d   :  { %v180_v34 = vpop.permute.xlu1 %179  ;;  %v175_v35 = vpop.permute.xlu0 %174  ;;  %v315_v45 = vunpack.c.l.b16 %v299_v27  ;;  %vm2902_vm12 = vcmask 7168   ;;  %1596 = vmatpush3.bf16.msra.mxu0 %v1651_v63  ;;  %v2206_v20 = vld [vmem:[#allocation2 + $0x18] sm:$0xff]  ;;  %v2321_v27 = vld [vmem:[#allocation2 + $0x68] sm:$0xff] }
  0x9e   :  { %v203_v36 = vadd.f32 %v1933_v32, %v180_v34  ;;  %v202_v37 = vadd.f32 %v1933_v32, %v175_v35  ;;  %v248_v40 = vsel %vm216_vm4, %v200_v19, %v232_v29  ;;  %v249_v48 = vsel %vm217_vm15, %v201_v18, %v233_v28  ;;  %52 = vst.msk [vmem:[#allocation3] sm:$0xff] %vm2902_vm12, %v2855_v52  ;;  %vm2904_vm8 = vmmov %vm2902_vm12  ;;  %v2204_v19 = vld [vmem:[#allocation2 + $0x20] sm:$0xff]  ;;  %v1653_v28 = vld [vmem:[%s2834_s2 + $0x18] sm:$0xff]  }
  0x9f   :  { %v2115_v43 = vsel %vm2087_vm13, %v248_v40, -1e+30  ;;  %vm2903_vm13 = vmmov %vm2902_vm12  ;;  %54 = vst.msk [vmem:[#allocation3 + $0x10] sm:$0xff] %vm2904_vm8, %v2855_v52  ;;  %v2157_v54 = vsel %vm2105_vm0, %v249_v48, -1e+30  ;;  %1597 = vmatprep.subr.bf16.mxu0 %v1652_v11  ;;  %v2252_v63 = vld [vmem:[#allocation2 + $0x38] sm:$0xff] }
  0xa0   :  { %v235_v47 = vmul.f32 0.2, %v203_v36  ;;  %v234_v32 = vmul.f32 0.2, %v202_v37  ;;  %370 = vmax.xlane.f32.xlu0 %v2111_v0  ;;  %372 = vmax.xlane.f32.xlu1 %v2115_v43  ;;  %vm218_vm3 = vcmp.gt.f32.partialorder %v202_v37, 0.0  ;;  %vm219_vm4 = vcmp.gt.f32.partialorder %v203_v36, 0.0  ;;  %vm2905_vm14 = vmmov %vm2904_vm8 }
  0xa1   :  { %53 = vst.msk [vmem:[#allocation3 + $0x8] sm:$0xff] %vm2903_vm13, %v2855_v52  ;;  %vm2906_vm6 = vmmov %vm2904_vm8  ;;  %1598 = vmatpush3.bf16.msra.mxu0 %v1652_v11  ;;  %v2298_v40 = vld [vmem:[#allocation2 + $0x58] sm:$0xff] }
  0xa2   :  { %v250_v51 = vsel %vm218_vm3, %v202_v37, %v234_v32  ;;  %55 = vst.msk [vmem:[#allocation3 + $0x18] sm:$0xff] %vm2905_vm14, %v2855_v52  ;;  %vm2907_vm15 = vmmov %vm2906_vm6  ;;  %v251_v56 = vsel %vm219_vm4, %v203_v36, %v235_v47  ;;  %1599 = vmatprep.subr.bf16.mxu0 %v1653_v28  ;;  %v2227_v36 = vld [vmem:[#allocation2 + $0x30] sm:$0xff]  ;;  %v2229_v37 = vld [vmem:[#allocation2 + $0x28] sm:$0xff] }
  0xa3   :  { %56 = vst.msk [vmem:[#allocation3 + $0x20] sm:$0xff] %vm2906_vm6, %v2855_v52  ;;  %vm2908_vm3 = vmmov %vm2906_vm6  ;;  %v2161_v55 = vsel %vm2117_vm7, %v250_v51, -1e+30  ;;  %v1654_v47 = vld [vmem:[%s2834_s2 + $0x20] sm:$0xff]  }
  0xa4   :  { %57 = vst.msk [vmem:[#allocation3 + $0x28] sm:$0xff] %vm2907_vm15, %v2855_v52  ;;  %vm2909_vm12 = vmmov %vm2908_vm3  ;;  %374 = vmax.xlane.f32.xlu0 %v2157_v54  ;;  %376 = vmax.xlane.f32.xlu1 %v2161_v55 }
  0xa5   :  { %58 = vst.msk [vmem:[#allocation3 + $0x30] sm:$0xff] %vm2908_vm3, %v2855_v52  ;;  %vm2910_vm13 = vmmov %vm2908_vm3  ;;  %1600 = vmatpush3.bf16.msra.mxu0 %v1653_v28 }
  0xa6   :  { %59 = vst.msk [vmem:[#allocation3 + $0x38] sm:$0xff] %vm2909_vm12, %v2855_v52  ;;  %vm2911_vm8 = vmmov %vm2908_vm3  ;;  %1601 = vmatprep.subr.bf16.mxu0 %v1654_v47 }
  0xa7   :  { %60 = vst.msk [vmem:[#allocation3 + $0x40] sm:$0xff] %vm2910_vm13, %v2855_v52  ;;  %vm2912_vm14 = vmmov %vm2908_vm3 }
  0xa8   :  { %61 = vst.msk [vmem:[#allocation3 + $0x48] sm:$0xff] %vm2911_vm8, %v2855_v52  ;;  %vm2913_vm6 = vmmov %vm2908_vm3  ;;  %vm2166_vm8 = vcmp.ne.s32.totalorder %v315_v45, 0  ;;  %v2319_v45 = vld [vmem:[#allocation2 + $0x70] sm:$0xff] }
  0xa9   :  { %62 = vst.msk [vmem:[#allocation3 + $0x50] sm:$0xff] %vm2912_vm14, %v2855_v52  ;;  %vm2914_vm15 = vmmov %vm2908_vm3  ;;  %v2172_v59 = vsel %vm2166_vm8, %v251_v56, -1e+30  ;;  %1602 = vmatpush3.bf16.msra.mxu0 %v1654_v47  ;;  %v2273_v47 = vld [vmem:[#allocation2 + $0x50] sm:$0xff] }
  0xaa   :  { %63 = vst.msk [vmem:[#allocation3 + $0x58] sm:$0xff] %vm2913_vm6, %v2855_v52  ;;  %vm2915_vm12 = vmmov %vm2908_vm3  ;;  %378 = vmax.xlane.f32.xlu0 %v2172_v59 }
  0xab   :  { %64 = vst.msk [vmem:[#allocation3 + $0x60] sm:$0xff] %vm2914_vm15, %v2855_v52  ;;  %vm2916_vm13 = vmmov %vm2908_vm3 }
  0xac   :  { %65 = vst.msk [vmem:[#allocation3 + $0x68] sm:$0xff] %vm2908_vm3, %v2855_v52  ;;  %vm2919_vm4 = vmmov %vm2908_vm3 }
  0xad   :  { %66 = vst.msk [vmem:[#allocation3 + $0x70] sm:$0xff] %vm2915_vm12, %v2855_v52  ;;  %vm2920_vm14 = vmmov %vm2908_vm3 }
  0xae   :  { %67 = vst.msk [vmem:[#allocation3 + $0x78] sm:$0xff] %vm2916_vm13, %v2855_v52  ;;  %vm2921_vm6 = vmmov %vm2908_vm3 }
  0xaf   :  { %vm2922_vm15 = vmmov %vm2908_vm3  ;;  %2925 = vst [vmem:[#allocation5_spill] sm:$0xff] %v2273_v47 }
  0xb0   :  { %vm2923_vm12 = vmmov %vm2908_vm3  ;;  %2932 = vst [vmem:[#allocation10_spill] sm:$0xff] %v2298_v40 }
  0xb1   :  { %vm2924_vm13 = vmmov %vm2908_vm3  ;;  %2937 = vst [vmem:[#allocation13_spill] sm:$0xff] %v2319_v45 }
  0xb2   :  { %2938 = vst [vmem:[#allocation14_spill] sm:$0xff] %v2321_v27 }
 0x115   :  { %v349_v2 = vpop.xlane.xlu0 %348 }
 0x116   :  { %v2184_v3 = vmax.f32 %v2181_v1, %v349_v2  ;;  %v2296_v2 = vld [vmem:[#allocation2 + $0x60] sm:$0xff] }
 0x117   :  { %2931 = vst [vmem:[#allocation9_spill] sm:$0xff] %v2296_v2 }
 0x118   :  { %1015 = vst.msk [vmem:[#allocation2] sm:$0xff] %vm2919_vm4, %v2184_v3  ;;  %462 = vperm.xlu1 %1649, %v2184_v3   ;;  %vm2927_vm4 = vmmov %vm2908_vm3 }
 0x119   :  { %v351_v12 = vpop.xlane.xlu1 %350  ;;  %v353_v13 = vpop.xlane.xlu0 %352 }
 0x11a   :  { %v2199_v17 = vmax.f32 %v2186_v6, %v351_v12  ;;  %v2202_v18 = vmax.f32 %v2188_v9, %v353_v13  ;;  %v1655_v12 = vld [vmem:[%s2834_s2 + $0x28] sm:$0xff]  }
 0x11b   :  { %1603 = vmatprep.subr.bf16.mxu0 %v1655_v12 }
 0x11c   :  { %1016 = vst.msk [vmem:[#allocation2 + $0x8] sm:$0xff] %vm2920_vm14, %v2199_v17  ;;  %467 = vperm.xlu0 %1648, %v2199_v17   ;;  %472 = vperm.xlu1 %1649, %v2202_v18   ;;  %vm2928_vm14 = vmmov %vm2908_vm3  ;;  %v2956_v44 = vsub.f32 %v2186_v6, %v2199_v17 }
 0x11d   :  { %1017 = vst.msk [vmem:[#allocation2 + $0x10] sm:$0xff] %vm2921_vm6, %v2202_v18  ;;  %v357_v29 = vpop.xlane.xlu1 %356  ;;  %v355_v33 = vpop.xlane.xlu0 %354  ;;  %1604 = vmatpush3.bf16.msra.mxu0 %v1655_v12  ;;  %v1656_v12 = vld [vmem:[%s2834_s2 + $0x30] sm:$0xff]   ;;  %vm2933_vm6 = vmmov %vm2908_vm3 }
 0x11e   :  { %v2222_v34 = vmax.f32 %v2204_v19, %v357_v29  ;;  %v2225_v35 = vmax.f32 %v2206_v20, %v355_v33  ;;  %1605 = vmatprep.subr.bf16.mxu0 %v1656_v12 }
 0x120   :  { %1019 = vst.msk [vmem:[#allocation2 + $0x20] sm:$0xff] %vm2922_vm15, %v2222_v34  ;;  %482 = vperm.xlu0 %1648, %v2222_v34   ;;  %477 = vperm.xlu1 %1649, %v2225_v35   ;;  %vm2934_vm15 = vmmov %vm2908_vm3  ;;  %v2959_v6 = vsub.f32 %v2204_v19, %v2222_v34 }
 0x121   :  { %1018 = vst.msk [vmem:[#allocation2 + $0x18] sm:$0xff] %vm2908_vm3, %v2225_v35  ;;  %v361_v32 = vpop.xlane.xlu1 %360  ;;  %v359_v48 = vpop.xlane.xlu0 %358  ;;  %1606 = vmatpush3.bf16.msra.mxu0 %v1656_v12  ;;  %v1657_v12 = vld [vmem:[%s2834_s2 + $0x38] sm:$0xff]  }
 0x122   :  { %v2245_v51 = vmax.f32 %v2227_v36, %v361_v32  ;;  %v2248_v56 = vmax.f32 %v2229_v37, %v359_v48  ;;  %v2275_v32 = vld [vmem:[#allocation2 + $0x48] sm:$0xff]  ;;  %1607 = vmatprep.subr.bf16.mxu0 %v1657_v12 }
 0x123   :  { %2926 = vst [vmem:[#allocation6_spill] sm:$0xff] %v2275_v32 }
 0x124   :  { %1021 = vst.msk [vmem:[#allocation2 + $0x30] sm:$0xff] %vm2923_vm12, %v2245_v51  ;;  %492 = vperm.xlu0 %1648, %v2245_v51   ;;  %487 = vperm.xlu1 %1649, %v2248_v56   ;;  %vm2939_vm12 = vmmov %vm2908_vm3  ;;  %v2960_v17 = vsub.f32 %v2229_v37, %v2248_v56 }
 0x125   :  { %1020 = vst.msk [vmem:[#allocation2 + $0x28] sm:$0xff] %vm2924_vm13, %v2248_v56  ;;  %v365_v13 = vpop.xlane.xlu1 %364  ;;  %v363_v28 = vpop.xlane.xlu0 %362  ;;  %1608 = vmatpush3.bf16.msra.mxu0 %v1657_v12  ;;  %vm2943_vm13 = vmmov %vm2908_vm3 }
 0x126   :  { %v2268_v29 = vmax.f32 %v2250_v62, %v365_v13  ;;  %v2271_v33 = vmax.f32 %v2252_v63, %v363_v28 }
 0x128   :  { %1023 = vst.msk [vmem:[#allocation2 + $0x40] sm:$0xff] %vm2927_vm4, %v2268_v29  ;;  %502 = vperm.xlu0 %1648, %v2268_v29   ;;  %497 = vperm.xlu1 %1649, %v2271_v33   ;;  %vm2944_vm4 = vmmov %vm2908_vm3  ;;  %v2963_v19 = vsub.f32 %v2250_v62, %v2268_v29 }
 0x129   :  { %1022 = vst.msk [vmem:[#allocation2 + $0x38] sm:$0xff] %vm2928_vm14, %v2271_v33  ;;  %v369_v13 = vpop.xlane.xlu1 %368  ;;  %v367_v28 = vpop.xlane.xlu0 %366  ;;  %vm2946_vm14 = vmmov %vm2908_vm3 }
 0x12a   :  { %v2291_v48 = vmax.f32 %v2273_v47, %v369_v13  ;;  %v2294_v11 = vmax.f32 %v2275_v32, %v367_v28  ;;  %v444_v34 = vmul.f32 1.442695, %v2963_v19  ;;  %v2964_v37 = vld [vmem:[#allocation6_spill] sm:$0xff] }
 0x12c   :  { %2929 = vst [vmem:[#allocation7_spill] sm:$0xff] %v2291_v48  ;;  %2930 = vst [vmem:[#allocation8_spill] sm:$0xff] %v2294_v11  ;;  %512 = vperm.xlu0 %1648, %v2291_v48   ;;  %507 = vperm.xlu1 %1649, %v2294_v11  }
 0x12d   :  { %1025 = vst.msk [vmem:[#allocation2 + $0x50] sm:$0xff] %vm2933_vm6, %v2291_v48  ;;  %v373_v13 = vpop.xlane.xlu1 %372  ;;  %v371_v28 = vpop.xlane.xlu0 %370  ;;  %vm1515_vm6 = vmpackc.low %vm1954_vm11, %vm1939_vm9 }
 0x12e   :  { %1024 = vst.msk [vmem:[#allocation2 + $0x48] sm:$0xff] %vm2934_vm15, %v2294_v11  ;;  %v2314_v52 = vmax.f32 %v2296_v2, %v373_v13  ;;  %v2317_v26 = vmax.f32 %v2298_v40, %v371_v28  ;;  %v2339_v2 = vld [vmem:[#allocation2 + $0x78] sm:$0xff]  ;;  %vm1518_vm15 = vmpackc.low %vm1959_vm1, %vm1943_vm10 }
 0x12f   :  { %2942 = vst [vmem:[#allocation17_spill] sm:$0xff] %v2339_v2 }
 0x130   :  { %2935 = vst [vmem:[#allocation11_spill] sm:$0xff] %v2314_v52  ;;  %2936 = vst [vmem:[#allocation12_spill] sm:$0xff] %v2317_v26  ;;  %522 = vperm.xlu0 %1648, %v2314_v52   ;;  %517 = vperm.xlu1 %1649, %v2317_v26  }
 0x131   :  { %1027 = vst.msk [vmem:[#allocation2 + $0x60] sm:$0xff] %vm2908_vm3, %v2314_v52  ;;  %v377_v13 = vpop.xlane.xlu1 %376  ;;  %v375_v28 = vpop.xlane.xlu0 %374 }
 0x132   :  { %1026 = vst.msk [vmem:[#allocation2 + $0x58] sm:$0xff] %vm2939_vm12, %v2317_v26  ;;  %v2334_v12 = vmax.f32 %v2319_v45, %v377_v13  ;;  %v2337_v10 = vmax.f32 %v2321_v27, %v375_v28  ;;  %vm2951_vm12 = vnez %v2892_v58 }
 0x133   :  { %v2965_v56 = vld [vmem:[#allocation8_spill] sm:$0xff] }
 0x134   :  { %2940 = vst [vmem:[#allocation15_spill] sm:$0xff] %v2334_v12  ;;  %2941 = vst [vmem:[#allocation16_spill] sm:$0xff] %v2337_v10  ;;  %532 = vperm.xlu0 %1648, %v2334_v12   ;;  %527 = vperm.xlu1 %1649, %v2337_v10  }
 0x135   :  { %1029 = vst.msk [vmem:[#allocation2 + $0x70] sm:$0xff] %vm2943_vm13, %v2334_v12  ;;  %vm2952_vm13 = vnez %v2895_v16 }
 0x136   :  { %1028 = vst.msk [vmem:[#allocation2 + $0x68] sm:$0xff] %vm2944_vm4, %v2337_v10  ;;  %vm1530_vm4 = vmpackc.low %vm2952_vm13, %vm2951_vm12 }
 0x137   :  { %v379_v13 = vpop.xlane.xlu0 %378 }
 0x138   :  { %v2352_v28 = vmax.f32 %v2339_v2, %v379_v13 }
 0x13a   :  { %2945 = vst [vmem:[#allocation18_spill] sm:$0xff] %v2352_v28  ;;  %1030 = vst.msk [vmem:[#allocation2 + $0x78] sm:$0xff] %vm2946_vm14, %v2352_v28  ;;  %537 = vperm.xlu1 %1649, %v2352_v28   ;;  %vm2953_vm14 = vnez %v2897_v22  ;;  %v2954_v22 = vsub.f32 %v2181_v1, %v2184_v3  ;;  %v2957_v1 = vsub.f32 %v2206_v20, %v2225_v35 }
 0x13b   :  { %v2961_v35 = vsub.f32 %v2227_v36, %v2245_v51 }
 0x13c   :  { %v434_v3 = vmul.f32 1.442695, %v2957_v1 }
 0x197   :  { %v463_v52 = vpop.permute.xlu1 %462 }
 0x198   :  { %v540_v45 = vsub.f32 %v1968_v60, %v463_v52 }
 0x19a   :  { %v556_v27 = vmul.f32 1.442695, %v540_v45 }
 0x19b   :  { %v473_v26 = vpop.permute.xlu1 %472  ;;  %v468_v12 = vpop.permute.xlu0 %467 }
 0x19c   :  { %1660 = vpow2.f32 %v556_v27  ;;  %v542_v10 = vsub.f32 %v1995_v14, %v473_v26  ;;  %v541_v13 = vsub.f32 %v1999_v15, %v468_v12 }
 0x19e   :  { %v560_v40 = vmul.f32 1.442695, %v542_v10  ;;  %v558_v47 = vmul.f32 1.442695, %v541_v13 }
 0x19f   :  { %v478_v11 = vpop.permute.xlu1 %477  ;;  %v483_v48 = vpop.permute.xlu0 %482 }
 0x1a0   :  { %1662 = vpow2.f32 %v560_v40  ;;  %v543_v2 = vsub.f32 %v2024_v30, %v478_v11  ;;  %v544_v28 = vsub.f32 %v2028_v31, %v483_v48 }
 0x1a1   :  { %1664 = vpow2.f32 %v558_v47 }
 0x1a2   :  { %v562_v32 = vmul.f32 1.442695, %v543_v2  ;;  %v564_v60 = vmul.f32 1.442695, %v544_v28 }
 0x1a3   :  { %v488_v52 = vpop.permute.xlu1 %487  ;;  %v493_v45 = vpop.permute.xlu0 %492 }
 0x1a4   :  { %1666 = vpow2.f32 %v562_v32  ;;  %v545_v27 = vsub.f32 %v2049_v49, %v488_v52  ;;  %v546_v14 = vsub.f32 %v2053_v50, %v493_v45 }
 0x1a5   :  { %1668 = vpow2.f32 %v564_v60 }
 0x1a6   :  { %v1661_v15 = vpop.eup %1660  ;;  %v566_v10 = vmul.f32 1.442695, %v545_v27  ;;  %v568_v26 = vmul.f32 1.442695, %v546_v14 }
 0x1a7   :  { %v498_v12 = vpop.permute.xlu1 %497  ;;  %v503_v40 = vpop.permute.xlu0 %502  ;;  %v588_v30 = vsel %vm1939_vm9, %v1661_v15, 0.0  ;;  %vm1521_vm9 = vmpackc.low %vm1980_vm5, %vm1970_vm2 }
 0x1a8   :  { %1670 = vpow2.f32 %v566_v10  ;;  %v547_v31 = vsub.f32 %v2070_v4, %v498_v12  ;;  %v548_v2 = vsub.f32 %v2074_v5, %v503_v40  ;;  %636 = vadd.xlane.f32.xlu0 %v588_v30 }
 0x1a9   :  { %1672 = vpow2.f32 %v568_v26 }
 0x1aa   :  { %v1663_v11 = vpop.eup %1662  ;;  %v570_v49 = vmul.f32 1.442695, %v547_v31  ;;  %v572_v47 = vmul.f32 1.442695, %v548_v2 }
 0x1ab   :  { %v1665_v50 = vpop.eup %1664  ;;  %v508_v32 = vpop.permute.xlu1 %507  ;;  %v590_v28 = vsel %vm1943_vm10, %v1663_v11, 0.0  ;;  %vm2947_vm10 = vnez %v2884_v8 }
 0x1ac   :  { %v513_v48 = vpop.permute.xlu0 %512  ;;  %1674 = vpow2.f32 %v570_v49  ;;  %v549_v13 = vsub.f32 %v2093_v23, %v508_v32  ;;  %640 = vadd.xlane.f32.xlu0 %v590_v28  ;;  %v589_v4 = vsel %vm1954_vm11, %v1665_v50, 0.0  ;;  %v1516_v5 = vpack.c.bf16 %v1665_v50, %v1661_v15 }
 0x1ad   :  { %v550_v60 = vsub.f32 %v2097_v25, %v513_v48  ;;  %1676 = vpow2.f32 %v572_v47  ;;  %638 = vadd.xlane.f32.xlu1 %v589_v4  ;;  %vm2948_vm11 = vnez %v2886_v21 }
 0x1ae   :  { %v1667_v52 = vpop.eup %1666  ;;  %v574_v45 = vmul.f32 1.442695, %v549_v13  ;;  %1609 = vmatprep.mubr.msk.bf16.mxu0 %vm1515_vm6, %v1516_v5  ;;  %vm1533_vm6 = vmpackc.low %vm2105_vm0, %vm2953_vm14 }
 0x1af   :  { %v576_v27 = vmul.f32 1.442695, %v550_v60  ;;  %v1669_v23 = vpop.eup %1668  ;;  %v518_v25 = vpop.permute.xlu1 %517  ;;  %v591_v38 = vsel %vm1959_vm1, %v1667_v52, 0.0  ;;  %v1519_v46 = vpack.c.bf16 %v1667_v52, %v1663_v11  ;;  %vm1524_vm1 = vmpackc.low %vm2948_vm11, %vm2947_vm10 }
 0x1b0   :  { %v523_v14 = vpop.permute.xlu0 %522  ;;  %1678 = vpow2.f32 %v574_v45  ;;  %v551_v10 = vsub.f32 %v2111_v0, %v518_v25  ;;  %642 = vadd.xlane.f32.xlu0 %v591_v38  ;;  %v592_v39 = vsel %vm1970_vm2, %v1669_v23, 0.0  ;;  %vm2949_vm2 = vnez %v2888_v24 }
 0x1b1   :  { %v552_v15 = vsub.f32 %v2115_v43, %v523_v14  ;;  %1680 = vpow2.f32 %v576_v27  ;;  %644 = vadd.xlane.f32.xlu1 %v592_v39  ;;  %1610 = vmatmul.mubr.msk.bf16.vlgmr.msra.gmra.mrb[0].mxu0 %vm1518_vm15, %v1519_v46  ;;  %vm1536_vm15 = vmpackc.low %vm2166_vm8, %vm2117_vm7  ;;  %v428_v38 = vmul.f32 1.442695, %v2954_v22  ;;  %v430_v39 = vmul.f32 1.442695, %v2956_v44  ;;  %v605_v44 = vld [vmem:[#allocation3 + $0x8] sm:$0xff] }
 0x1b2   :  { %v1671_v26 = vpop.eup %1670  ;;  %v578_v12 = vmul.f32 1.442695, %v551_v10  ;;  %v2955_v10 = vsub.f32 %v2188_v9, %v2202_v18  ;;  %v436_v9 = vmul.f32 1.442695, %v2959_v6  ;;  %v438_v18 = vmul.f32 1.442695, %v2960_v17 }
 0x1b3   :  { %v580_v40 = vmul.f32 1.442695, %v552_v15  ;;  %v1673_v53 = vpop.eup %1672  ;;  %v528_v30 = vpop.permute.xlu1 %527  ;;  %v593_v43 = vsel %vm1980_vm5, %v1671_v26, 0.0  ;;  %v1522_v31 = vpack.c.bf16 %v1671_v26, %v1669_v23  ;;  %vm2950_vm5 = vnez %v2890_v41  ;;  %v608_v17 = vld [vmem:[#allocation3 + $0x20] sm:$0xff] }
 0x1b4   :  { %v533_v0 = vpop.permute.xlu0 %532  ;;  %1682 = vpow2.f32 %v578_v12  ;;  %v553_v2 = vsub.f32 %v2157_v54, %v528_v30  ;;  %646 = vadd.xlane.f32.xlu0 %v593_v43  ;;  %v594_v49 = vsel %vm2947_vm10, %v1673_v53, 0.0  ;;  %vm1527_vm3 = vmpackc.low %vm2950_vm5, %vm2949_vm2  ;;  %v432_v15 = vmul.f32 1.442695, %v2955_v10  ;;  %v2967_v43 = vld [vmem:[#allocation5_spill] sm:$0xff]  ;;  %v606_v10 = vld [vmem:[#allocation3 + $0x10] sm:$0xff] }
 0x1b5   :  { %v554_v11 = vsub.f32 %v2161_v55, %v533_v0  ;;  %1684 = vpow2.f32 %v580_v40  ;;  %648 = vadd.xlane.f32.xlu1 %v594_v49  ;;  %1613 = vmatprep.mubr.msk.bf16.mxu0 %vm1521_vm9, %v1522_v31  ;;  %v440_v26 = vmul.f32 1.442695, %v2961_v35  ;;  %v2962_v12 = vsub.f32 %v2252_v63, %v2271_v33  ;;  %v2968_v31 = vld [vmem:[#allocation7_spill] sm:$0xff]  ;;  %v2970_v33 = vld [vmem:[#allocation10_spill] sm:$0xff] }
 0x1b6   :  { %v1675_v61 = vpop.eup %1674  ;;  %v582_v47 = vmul.f32 1.442695, %v553_v2  ;;  %v2966_v30 = vsub.f32 %v2964_v37, %v2965_v56  ;;  %v2969_v2 = vsub.f32 %v2967_v43, %v2968_v31  ;;  %v611_v43 = vld [vmem:[#allocation3 + $0x38] sm:$0xff] }
 0x1b7   :  { %v584_v50 = vmul.f32 1.442695, %v554_v11  ;;  %v1677_v7 = vpop.eup %1676  ;;  %v595_v54 = vsel %vm2948_vm11, %v1675_v61, 0.0  ;;  %v1525_v55 = vpack.c.bf16 %v1675_v61, %v1673_v53  ;;  %v442_v40 = vmul.f32 1.442695, %v2962_v12  ;;  %v2971_v11 = vld [vmem:[#allocation12_spill] sm:$0xff] }
 0x1b8   :  { %1686 = vpow2.f32 %v582_v47  ;;  %650 = vadd.xlane.f32.xlu0 %v595_v54  ;;  %v596_v28 = vsel %vm2949_vm2, %v1677_v7, 0.0  ;;  %v446_v0 = vmul.f32 1.442695, %v2966_v30  ;;  %v448_v63 = vmul.f32 1.442695, %v2969_v2  ;;  %v2973_v47 = vld [vmem:[#allocation9_spill] sm:$0xff] }
 0x1b9   :  { %v538_v32 = vpop.permute.xlu1 %537  ;;  %1688 = vpow2.f32 %v584_v50  ;;  %652 = vadd.xlane.f32.xlu1 %v596_v28  ;;  %1614 = vmatmul.mubr.msk.bf16.gmra.mrb[4].mxu0 %vm1524_vm1, %v1525_v55  ;;  %v2972_v62 = vsub.f32 %v2970_v33, %v2971_v11  ;;  %v2974_v50 = vld [vmem:[#allocation11_spill] sm:$0xff]  ;;  %v2976_v54 = vld [vmem:[#allocation14_spill] sm:$0xff]  ;;  %v2977_v55 = vld [vmem:[#allocation16_spill] sm:$0xff] }
 0x1ba   :  { %v555_v48 = vsub.f32 %v2172_v59, %v538_v32  ;;  %v1679_v8 = vpop.eup %1678  ;;  %v609_v12 = vld [vmem:[#allocation3 + $0x28] sm:$0xff]  ;;  %v612_v2 = vld [vmem:[#allocation3 + $0x40] sm:$0xff] }
 0x1bb   :  { %v1681_v21 = vpop.eup %1680  ;;  %v597_v60 = vsel %vm2950_vm5, %v1679_v8, 0.0  ;;  %v1528_v4 = vpack.c.bf16 %v1679_v8, %v1677_v7  ;;  %v450_v29 = vmul.f32 1.442695, %v2972_v62  ;;  %v2975_v7 = vsub.f32 %v2973_v47, %v2974_v50  ;;  %v613_v47 = vld [vmem:[#allocation3 + $0x48] sm:$0xff] }
 0x1bc   :  { %v586_v13 = vmul.f32 1.442695, %v555_v48  ;;  %654 = vadd.xlane.f32.xlu0 %v597_v60  ;;  %v598_v59 = vsel %vm2951_vm12, %v1681_v21, 0.0  ;;  %v2978_v48 = vsub.f32 %v2976_v54, %v2977_v55  ;;  %v2980_v60 = vld [vmem:[#allocation15_spill] sm:$0xff] }
 0x1bd   :  { %656 = vadd.xlane.f32.xlu1 %v598_v59  ;;  %1617 = vmatprep.mubr.msk.bf16.mxu0 %vm1527_vm3, %v1528_v4  ;;  %v452_v32 = vmul.f32 1.442695, %v2975_v7  ;;  %v614_v54 = vld [vmem:[#allocation3 + $0x50] sm:$0xff] }
 0x1be   :  { %1690 = vpow2.f32 %v586_v13  ;;  %v1683_v5 = vpop.eup %1682  ;;  %v454_v28 = vmul.f32 1.442695, %v2978_v48 }
 0x1bf   :  { %v1685_v24 = vpop.eup %1684  ;;  %v599_v52 = vsel %vm2952_vm13, %v1683_v5, 0.0  ;;  %v1531_v41 = vpack.c.bf16 %v1683_v5, %v1681_v21  ;;  %1692 = vpow2.f32 %v428_v38  ;;  %v2979_v21 = vld [vmem:[#allocation13_spill] sm:$0xff] }
 0x1c0   :  { %658 = vadd.xlane.f32.xlu0 %v599_v52  ;;  %v600_v45 = vsel %vm2953_vm14, %v1685_v24, 0.0  ;;  %1694 = vpow2.f32 %v432_v15  ;;  %v2981_v4 = vsub.f32 %v2979_v21, %v2980_v60  ;;  %v2982_v5 = vld [vmem:[#allocation17_spill] sm:$0xff] }
 0x1c1   :  { %660 = vadd.xlane.f32.xlu1 %v600_v45  ;;  %1618 = vmatmul.mubr.msk.bf16.gmra.mrb[8].mxu0 %vm1530_vm4, %v1531_v41  ;;  %1696 = vpow2.f32 %v430_v39  ;;  %v604_v38 = vld [vmem:[#allocation3] sm:$0xff] }
 0x1c2   :  { %v1687_v27 = vpop.eup %1686  ;;  %1698 = vpow2.f32 %v434_v3  ;;  %v456_v59 = vmul.f32 1.442695, %v2981_v4  ;;  %v615_v4 = vld [vmem:[#allocation3 + $0x58] sm:$0xff] }
 0x1c3   :  { %v1689_v58 = vpop.eup %1688  ;;  %v601_v23 = vsel %vm2105_vm0, %v1687_v27, 0.0  ;;  %v1534_v25 = vpack.c.bf16 %v1687_v27, %v1685_v24  ;;  %vm68_vm0 = vcmask 261120   ;;  %1700 = vpow2.f32 %v436_v9  ;;  %v2983_v24 = vld [vmem:[#allocation18_spill] sm:$0xff] }
 0x1c4   :  { %662 = vadd.xlane.f32.xlu0 %v601_v23  ;;  %v602_v16 = vsel %vm2117_vm7, %v1689_v58, 0.0  ;;  %69 = vst.msk [vmem:[#allocation4] sm:$0xff] %vm68_vm0, %v2958_v57  ;;  %70 = vst.msk [vmem:[#allocation4 + $0x8] sm:$0xff] %vm68_vm0, %v2958_v57  ;;  %1702 = vpow2.f32 %v438_v18  ;;  %v2984_v52 = vsub.f32 %v2982_v5, %v2983_v24  ;;  %vm2985_vm7 = vcmask 7168  }
 0x1c5   :  { %664 = vadd.xlane.f32.xlu1 %v602_v16  ;;  %1621 = vmatprep.mubr.msk.bf16.mxu0 %vm1533_vm6, %v1534_v25  ;;  %71 = vst.msk [vmem:[#allocation4 + $0x10] sm:$0xff] %vm68_vm0, %v2958_v57  ;;  %72 = vst.msk [vmem:[#allocation4 + $0x18] sm:$0xff] %vm68_vm0, %v2958_v57  ;;  %1704 = vpow2.f32 %v440_v26 }
 0x1c6   :  { %73 = vst.msk [vmem:[#allocation4 + $0x20] sm:$0xff] %vm68_vm0, %v2958_v57  ;;  %74 = vst.msk [vmem:[#allocation4 + $0x28] sm:$0xff] %vm68_vm0, %v2958_v57  ;;  %1706 = vpow2.f32 %v442_v40  ;;  %v458_v41 = vmul.f32 1.442695, %v2984_v52  ;;  %v616_v52 = vld [vmem:[#allocation3 + $0x60] sm:$0xff] }
 0x1c7   :  { %75 = vst.msk [vmem:[#allocation4 + $0x30] sm:$0xff] %vm68_vm0, %v2958_v57  ;;  %76 = vst.msk [vmem:[#allocation4 + $0x38] sm:$0xff] %vm68_vm0, %v2958_v57  ;;  %1708 = vpow2.f32 %v444_v34  ;;  %v610_v34 = vld [vmem:[#allocation3 + $0x30] sm:$0xff] }
 0x1c8   :  { %v1691_v14 = vpop.eup %1690  ;;  %77 = vst.msk [vmem:[#allocation4 + $0x40] sm:$0xff] %vm68_vm0, %v2958_v57  ;;  %78 = vst.msk [vmem:[#allocation4 + $0x48] sm:$0xff] %vm68_vm0, %v2958_v57  ;;  %1710 = vpow2.f32 %v446_v0 }
 0x1c9   :  { %v603_v42 = vsel %vm2166_vm8, %v1691_v14, 0.0  ;;  %v1537_v46 = vpack.c.bf16 %v1691_v14, %v1689_v58  ;;  %79 = vst.msk [vmem:[#allocation4 + $0x50] sm:$0xff] %vm68_vm0, %v2958_v57  ;;  %80 = vst.msk [vmem:[#allocation4 + $0x58] sm:$0xff] %vm68_vm0, %v2958_v57  ;;  %v1693_v20 = vpop.eup %1692  ;;  %1712 = vpow2.f32 %v448_v63 }
 0x1ca   :  { %666 = vadd.xlane.f32.xlu0 %v603_v42  ;;  %81 = vst.msk [vmem:[#allocation4 + $0x60] sm:$0xff] %vm68_vm0, %v2958_v57  ;;  %82 = vst.msk [vmem:[#allocation4 + $0x68] sm:$0xff] %vm68_vm0, %v2958_v57  ;;  %v1695_v53 = vpop.eup %1694  ;;  %1714 = vpow2.f32 %v450_v29  ;;  %v620_v42 = vmul.f32 %v1693_v20, %v604_v38 }
 0x1cb   :  { %1622 = vmatmul.mubr.msk.bf16.gmra.mrb[12].mxu0 %vm1536_vm15, %v1537_v46  ;;  %83 = vst.msk [vmem:[#allocation4 + $0x70] sm:$0xff] %vm68_vm0, %v2958_v57  ;;  %84 = vst.msk [vmem:[#allocation4 + $0x78] sm:$0xff] %vm68_vm0, %v2958_v57  ;;  %v1697_v36 = vpop.eup %1696  ;;  %1716 = vpow2.f32 %v452_v32  ;;  %v622_v39 = vmul.f32 %v1695_v53, %v606_v10  ;;  %v607_v57 = vld [vmem:[#allocation3 + $0x18] sm:$0xff] }
 0x1cc   :  { %v1699_v51 = vpop.eup %1698  ;;  %1718 = vpow2.f32 %v454_v28  ;;  %v621_v1 = vmul.f32 %v1697_v36, %v605_v44  ;;  %vm2986_vm8 = vmmov %vm2985_vm7 }
 0x1cd   :  { %v1701_v49 = vpop.eup %1700  ;;  %1720 = vpow2.f32 %v456_v59  ;;  %v623_v35 = vmul.f32 %v1699_v51, %v607_v57  ;;  %vm2987_vm9 = vmmov %vm2985_vm7 }
 0x1ce   :  { %v1703_v61 = vpop.eup %1702  ;;  %1722 = vpow2.f32 %v458_v41  ;;  %vm2988_vm10 = vmmov %vm2985_vm7 }
 0x1cf   :  { %v1705_v8 = vpop.eup %1704  ;;  %v625_v56 = vmul.f32 %v1703_v61, %v609_v12  ;;  %vm2989_vm11 = vmmov %vm2985_vm7 }
 0x1d0   :  { %v2513_v13 = vpop.eup %1706  ;;  %v626_v0 = vmul.f32 %v1705_v8, %v610_v34  ;;  %vm2990_vm1 = vmmov %vm2985_vm7 }
 0x1d1   :  { %v1709_v45 = vpop.eup %1708  ;;  %v627_v11 = vmul.f32 %v2513_v13, %v611_v43  ;;  %vm2991_vm2 = vmmov %vm2990_vm1 }
 0x1d2   :  { %v2522_v27 = vpop.eup %1710  ;;  %vm2992_vm5 = vmmov %vm2990_vm1 }
 0x1d3   :  { %v2525_v58 = vpop.eup %1712  ;;  %v629_v28 = vmul.f32 %v2522_v27, %v613_v47  ;;  %vm2993_vm3 = vmmov %vm2990_vm1 }
 0x1d4   :  { %v2527_v23 = vpop.eup %1714  ;;  %v630_v21 = vmul.f32 %v2525_v58, %v614_v54  ;;  %vm2994_vm12 = vmmov %vm2990_vm1 }
 0x1d5   :  { %v2531_v25 = vpop.eup %1716  ;;  %vm2995_vm13 = vmmov %vm2990_vm1 }
 0x1d6   :  { %719 = vperm.xlu1 %1649, %v1693_v20   ;;  %v2533_v16 = vpop.eup %1718  ;;  %v624_v20 = vmul.f32 %v1701_v49, %v608_v17  ;;  %vm2996_vm4 = vmmov %vm2990_vm1 }
 0x1d7   :  { %v2537_v14 = vpop.eup %1720  ;;  %vm2997_vm14 = vmmov %vm2990_vm1 }
 0x1d8   :  { %v2539_v22 = vpop.eup %1722  ;;  %vm2998_vm6 = vmmov %vm2990_vm1 }
 0x1d9   :  { %vm2999_vm15 = vmmov %vm2990_vm1 }
 0x1da   :  { %729 = vperm.xlu1 %1649, %v1695_v53  }
 0x1de   :  { %734 = vperm.xlu1 %1649, %v1699_v51  }
 0x1e0   :  { %724 = vperm.xlu0 %1648, %v1697_v36  }
 0x1e2   :  { %744 = vperm.xlu1 %1649, %v1703_v61  }
 0x1e4   :  { %739 = vperm.xlu0 %1648, %v1701_v49   ;;  %v628_v49 = vmul.f32 %v1709_v45, %v612_v2 }
 0x1e6   :  { %754 = vperm.xlu1 %1649, %v2513_v13  }
 0x1e8   :  { %749 = vperm.xlu0 %1648, %v1705_v8  }
 0x1ea   :  { %764 = vperm.xlu1 %1649, %v2522_v27   ;;  %v631_v27 = vmul.f32 %v2527_v23, %v615_v4 }
 0x1ec   :  { %759 = vperm.xlu0 %1648, %v1709_v45  }
 0x1ee   :  { %774 = vperm.xlu1 %1649, %v2527_v23  }
 0x1f0   :  { %769 = vperm.xlu0 %1648, %v2525_v58   ;;  %v632_v58 = vmul.f32 %v2531_v25, %v616_v52 }
 0x1f2   :  { %784 = vperm.xlu1 %1649, %v2533_v16  }
 0x1f4   :  { %779 = vperm.xlu0 %1648, %v2531_v25  }
 0x1f6   :  { %794 = vperm.xlu1 %1649, %v2539_v22  }
 0x1f8   :  { %789 = vperm.xlu0 %1648, %v2537_v14  }
 0x235   :  { %v637_v46 = vpop.xlane.xlu0 %636 }
 0x236   :  { %v668_v15 = vadd.f32 %v637_v46, %v620_v42 }
 0x238   :  { %685 = vst.msk [vmem:[#allocation3] sm:$0xff] %vm2985_vm7, %v668_v15  ;;  %v617_v15 = vld [vmem:[#allocation3 + $0x68] sm:$0xff]  ;;  %vm3000_vm7 = vmmov %vm2990_vm1 }
 0x239   :  { %v641_v3 = vpop.xlane.xlu0 %640  ;;  %v633_v23 = vmul.f32 %v2533_v16, %v617_v15 }
 0x23a   :  { %v639_v6 = vpop.xlane.xlu1 %638  ;;  %v670_v9 = vadd.f32 %v641_v3, %v622_v39  ;;  %v618_v3 = vld [vmem:[#allocation3 + $0x70] sm:$0xff] }
 0x23b   :  { %v669_v18 = vadd.f32 %v639_v6, %v621_v1  ;;  %v634_v25 = vmul.f32 %v2537_v14, %v618_v3 }
 0x23c   :  { %687 = vst.msk [vmem:[#allocation3 + $0x10] sm:$0xff] %vm2986_vm8, %v670_v9 }
 0x23d   :  { %686 = vst.msk [vmem:[#allocation3 + $0x8] sm:$0xff] %vm2987_vm9, %v669_v18  ;;  %v643_v26 = vpop.xlane.xlu0 %642 }
 0x23e   :  { %v645_v40 = vpop.xlane.xlu1 %644  ;;  %v671_v19 = vadd.f32 %v643_v26, %v623_v35  ;;  %v619_v26 = vld [vmem:[#allocation3 + $0x78] sm:$0xff] }
 0x23f   :  { %v672_v37 = vadd.f32 %v645_v40, %v624_v20  ;;  %v1034_v53 = vld [vmem:[#allocation3] sm:$0xff]  ;;  %v635_v16 = vmul.f32 %v2539_v22, %v619_v26 }
 0x240   :  { %688 = vst.msk [vmem:[#allocation3 + $0x18] sm:$0xff] %vm2988_vm10, %v671_v19  ;;  %v1050_v30 = vmax.f32 %v1034_v53, 1e-30  ;;  %v705_v26 = vld [vmem:[#allocation4 + $0x20] sm:$0xff] }
 0x241   :  { %689 = vst.msk [vmem:[#allocation3 + $0x20] sm:$0xff] %vm2989_vm11, %v672_v37  ;;  %v647_v36 = vpop.xlane.xlu0 %646 }
 0x242   :  { %v649_v51 = vpop.xlane.xlu1 %648  ;;  %v673_v31 = vadd.f32 %v647_v36, %v625_v56  ;;  %1724 = vrcp.f32 %v1050_v30 }
 0x243   :  { %v674_v63 = vadd.f32 %v649_v51, %v626_v0  ;;  %v1036_v33 = vld [vmem:[#allocation3 + $0x10] sm:$0xff] }
 0x244   :  { %690 = vst.msk [vmem:[#allocation3 + $0x28] sm:$0xff] %vm2990_vm1, %v673_v31  ;;  %v1035_v62 = vld [vmem:[#allocation3 + $0x8] sm:$0xff]  ;;  %v1052_v29 = vmax.f32 %v1036_v33, 1e-30 }
 0x245   :  { %691 = vst.msk [vmem:[#allocation3 + $0x30] sm:$0xff] %vm2991_vm2, %v674_v63  ;;  %v651_v61 = vpop.xlane.xlu0 %650  ;;  %v1051_v50 = vmax.f32 %v1035_v62, 1e-30 }
 0x246   :  { %v653_v7 = vpop.xlane.xlu1 %652  ;;  %v675_v32 = vadd.f32 %v651_v61, %v627_v11  ;;  %1726 = vrcp.f32 %v1052_v29 }
 0x247   :  { %v676_v55 = vadd.f32 %v653_v7, %v628_v49  ;;  %1728 = vrcp.f32 %v1051_v50  ;;  %v1037_v48 = vld [vmem:[#allocation3 + $0x18] sm:$0xff] }
 0x248   :  { %692 = vst.msk [vmem:[#allocation3 + $0x38] sm:$0xff] %vm2992_vm5, %v675_v32  ;;  %v1038_v8 = vld [vmem:[#allocation3 + $0x20] sm:$0xff]  ;;  %v1053_v13 = vmax.f32 %v1037_v48, 1e-30 }
 0x249   :  { %693 = vst.msk [vmem:[#allocation3 + $0x40] sm:$0xff] %vm2993_vm3, %v676_v55  ;;  %v655_v60 = vpop.xlane.xlu0 %654  ;;  %v1054_v59 = vmax.f32 %v1038_v8, 1e-30 }
 0x24a   :  { %v657_v5 = vpop.xlane.xlu1 %656  ;;  %v677_v24 = vadd.f32 %v655_v60, %v629_v28  ;;  %1730 = vrcp.f32 %v1053_v13  ;;  %v1658_v28 = vld [vmem:[%s2835_s5] sm:$0xff]   ;;  %v1659_v60 = vld [vmem:[%s2835_s5 + $0x8] sm:$0xff]  }
 0x24b   :  { %v678_v41 = vadd.f32 %v657_v5, %v630_v21  ;;  %1732 = vrcp.f32 %v1054_v59  ;;  %v1039_v45 = vld [vmem:[#allocation3 + $0x28] sm:$0xff]  ;;  %1625 = vmatprep.subr.bf16.mxu1 %v1658_v28 }
 0x24c   :  { %v1725_v38 = vpop.eup %1724  ;;  %694 = vst.msk [vmem:[#allocation3 + $0x48] sm:$0xff] %vm2994_vm12, %v677_v24  ;;  %v1040_v42 = vld [vmem:[#allocation3 + $0x30] sm:$0xff]  ;;  %v1055_v46 = vmax.f32 %v1039_v45, 1e-30  ;;  %1626 = vmatpush3.bf16.msra.mxu1 %v1658_v28 }
 0x24d   :  { %695 = vst.msk [vmem:[#allocation3 + $0x50] sm:$0xff] %vm2995_vm13, %v678_v41  ;;  %1100 = vperm.xlu0 %1648, %v1725_v38   ;;  %v659_v10 = vpop.xlane.xlu0 %658  ;;  %v1056_v44 = vmax.f32 %v1040_v42, 1e-30  ;;  %1627 = vmatprep.subr.bf16.mxu1 %v1659_v60  ;;  %v703_v45 = vld [vmem:[#allocation4 + $0x10] sm:$0xff]  ;;  %v704_v42 = vld [vmem:[#allocation4 + $0x18] sm:$0xff] }
 0x24e   :  { %v661_v39 = vpop.xlane.xlu1 %660  ;;  %v679_v1 = vadd.f32 %v659_v10, %v631_v27  ;;  %1734 = vrcp.f32 %v1055_v46  ;;  %v701_v27 = vld [vmem:[#allocation4] sm:$0xff]  ;;  %v702_v10 = vld [vmem:[#allocation4 + $0x8] sm:$0xff] }
 0x24f   :  { %v680_v57 = vadd.f32 %v661_v39, %v632_v58  ;;  %1736 = vrcp.f32 %v1056_v44  ;;  %v1041_v6 = vld [vmem:[#allocation3 + $0x38] sm:$0xff] }
 0x250   :  { %v1727_v9 = vpop.eup %1726  ;;  %696 = vst.msk [vmem:[#allocation3 + $0x58] sm:$0xff] %vm2996_vm4, %v679_v1  ;;  %v1042_v17 = vld [vmem:[#allocation3 + $0x40] sm:$0xff]  ;;  %v1057_v18 = vmax.f32 %v1041_v6, 1e-30  ;;  %1628 = vmatpush3.bf16.msra.mxu1 %v1659_v60 }
 0x251   :  { %v1729_v35 = vpop.eup %1728  ;;  %697 = vst.msk [vmem:[#allocation3 + $0x60] sm:$0xff] %vm2997_vm14, %v680_v57  ;;  %1110 = vperm.xlu0 %1648, %v1727_v9   ;;  %v663_v20 = vpop.xlane.xlu0 %662  ;;  %v1058_v12 = vmax.f32 %v1042_v17, 1e-30 }
 0x252   :  { %1105 = vperm.xlu1 %1649, %v1729_v35   ;;  %v665_v40 = vpop.xlane.xlu1 %664  ;;  %v681_v19 = vadd.f32 %v663_v20, %v633_v23  ;;  %1738 = vrcp.f32 %v1057_v18  ;;  %v707_v35 = vld [vmem:[#allocation4 + $0x30] sm:$0xff] }
 0x253   :  { %v682_v34 = vadd.f32 %v665_v40, %v634_v25  ;;  %1740 = vrcp.f32 %v1058_v12  ;;  %v1043_v37 = vld [vmem:[#allocation3 + $0x48] sm:$0xff]  ;;  %v708_v12 = vld [vmem:[#allocation4 + $0x38] sm:$0xff] }
 0x254   :  { %v1731_v53 = vpop.eup %1730  ;;  %698 = vst.msk [vmem:[#allocation3 + $0x68] sm:$0xff] %vm2998_vm6, %v681_v19  ;;  %v1044_v56 = vld [vmem:[#allocation3 + $0x50] sm:$0xff]  ;;  %v1059_v30 = vmax.f32 %v1043_v37, 1e-30  ;;  %v706_v40 = vld [vmem:[#allocation4 + $0x28] sm:$0xff] }
 0x255   :  { %v1733_v0 = vpop.eup %1732  ;;  %699 = vst.msk [vmem:[#allocation3 + $0x70] sm:$0xff] %vm2999_vm15, %v682_v34  ;;  %v1060_v36 = vmax.f32 %v1044_v56, 1e-30 }
 0x256   :  { %1120 = vperm.xlu0 %1648, %v1733_v0   ;;  %1115 = vperm.xlu1 %1649, %v1731_v53   ;;  %1742 = vrcp.f32 %v1059_v30  ;;  %v720_v21 = vpop.permute.xlu1 %719 }
 0x257   :  { %v667_v14 = vpop.xlane.xlu0 %666  ;;  %1744 = vrcp.f32 %v1060_v36  ;;  %v1045_v51 = vld [vmem:[#allocation3 + $0x58] sm:$0xff]  ;;  %v797_v15 = vmul.f32 %v720_v21, %v701_v27 }
 0x258   :  { %v683_v43 = vadd.f32 %v667_v14, %v635_v16  ;;  %v1735_v31 = vpop.eup %1734  ;;  %v1046_v2 = vld [vmem:[#allocation3 + $0x60] sm:$0xff]  ;;  %v1061_v63 = vmax.f32 %v1045_v51, 1e-30 }
 0x259   :  { %v1737_v33 = vpop.eup %1736  ;;  %v1062_v22 = vmax.f32 %v1046_v2, 1e-30  ;;  %v711_v2 = vld [vmem:[#allocation4 + $0x50] sm:$0xff] }
 0x25a   :  { %700 = vst.msk [vmem:[#allocation3 + $0x78] sm:$0xff] %vm3000_vm7, %v683_v43  ;;  %1130 = vperm.xlu0 %1648, %v1737_v33   ;;  %1125 = vperm.xlu1 %1649, %v1735_v31   ;;  %1746 = vrcp.f32 %v1061_v63  ;;  %v730_v59 = vpop.permute.xlu1 %729  ;;  %v709_v33 = vld [vmem:[#allocation4 + $0x40] sm:$0xff] }
 0x25b   :  { %1748 = vrcp.f32 %v1062_v22  ;;  %v1047_v11 = vld [vmem:[#allocation3 + $0x68] sm:$0xff]  ;;  %v799_v58 = vmul.f32 %v730_v59, %v703_v45  ;;  %v712_v22 = vld [vmem:[#allocation4 + $0x58] sm:$0xff] }
 0x25c   :  { %v1739_v62 = vpop.eup %1738  ;;  %v1048_v29 = vld [vmem:[#allocation3 + $0x70] sm:$0xff]  ;;  %v1063_v49 = vmax.f32 %v1047_v11, 1e-30  ;;  %v716_v59 = vld [vmem:[#allocation4 + $0x78] sm:$0xff] }
 0x25d   :  { %v1741_v61 = vpop.eup %1740  ;;  %v1064_v47 = vmax.f32 %v1048_v29, 1e-30 }
 0x25e   :  { %1140 = vperm.xlu0 %1648, %v1741_v61   ;;  %1135 = vperm.xlu1 %1649, %v1739_v62   ;;  %1750 = vrcp.f32 %v1063_v49  ;;  %v735_v24 = vpop.permute.xlu1 %734  ;;  %v710_v62 = vld [vmem:[#allocation4 + $0x48] sm:$0xff] }
 0x25f   :  { %1752 = vrcp.f32 %v1064_v47  ;;  %v725_v5 = vpop.permute.xlu0 %724  ;;  %v800_v39 = vmul.f32 %v735_v24, %v704_v42  ;;  %v714_v24 = vld [vmem:[#allocation4 + $0x68] sm:$0xff] }
 0x260   :  { %v1743_v7 = vpop.eup %1742  ;;  %v798_v57 = vmul.f32 %v725_v5, %v702_v10 }
 0x261   :  { %v1049_v50 = vld [vmem:[#allocation3 + $0x78] sm:$0xff]  ;;  %v1745_v54 = vpop.eup %1744 }
 0x262   :  { %v1065_v32 = vmax.f32 %v1049_v50, 1e-30  ;;  %1150 = vperm.xlu0 %1648, %v1745_v54   ;;  %1145 = vperm.xlu1 %1649, %v1743_v7   ;;  %v745_v41 = vpop.permute.xlu1 %744 }
 0x263   :  { %v740_v52 = vpop.permute.xlu0 %739  ;;  %v802_v0 = vmul.f32 %v745_v41, %v706_v40 }
 0x264   :  { %1754 = vrcp.f32 %v1065_v32  ;;  %v1747_v55 = vpop.eup %1746  ;;  %v801_v34 = vmul.f32 %v740_v52, %v705_v26 }
 0x265   :  { %v1749_v48 = vpop.eup %1748 }
 0x266   :  { %1160 = vperm.xlu0 %1648, %v1749_v48   ;;  %1155 = vperm.xlu1 %1649, %v1747_v55   ;;  %v755_v46 = vpop.permute.xlu1 %754 }
 0x267   :  { %v750_v38 = vpop.permute.xlu0 %749  ;;  %v804_v16 = vmul.f32 %v755_v46, %v708_v12 }
 0x268   :  { %v1751_v8 = vpop.eup %1750  ;;  %v803_v19 = vmul.f32 %v750_v38, %v707_v35 }
 0x269   :  { %v1753_v13 = vpop.eup %1752 }
 0x26a   :  { %1170 = vperm.xlu0 %1648, %v1753_v13   ;;  %1165 = vperm.xlu1 %1649, %v1751_v8   ;;  %v765_v25 = vpop.permute.xlu1 %764  ;;  %v715_v13 = vld [vmem:[#allocation4 + $0x70] sm:$0xff] }
 0x26b   :  { %v760_v6 = vpop.permute.xlu0 %759  ;;  %v806_v54 = vmul.f32 %v765_v25, %v710_v62 }
 0x26c   :  { %v805_v49 = vmul.f32 %v760_v6, %v709_v33 }
 0x26e   :  { %v1755_v4 = vpop.eup %1754  ;;  %v775_v14 = vpop.permute.xlu1 %774 }
 0x26f   :  { %1175 = vperm.xlu1 %1649, %v1755_v4   ;;  %v770_v37 = vpop.permute.xlu0 %769  ;;  %v808_v50 = vmul.f32 %v775_v14, %v712_v22  ;;  %v713_v4 = vld [vmem:[#allocation4 + $0x60] sm:$0xff] }
 0x270   :  { %v807_v29 = vmul.f32 %v770_v37, %v711_v2 }
 0x272   :  { %v785_v61 = vpop.permute.xlu1 %784 }
 0x273   :  { %v780_v11 = vpop.permute.xlu0 %779  ;;  %v810_v46 = vmul.f32 %v785_v61, %v714_v24 }
 0x274   :  { %v809_v41 = vmul.f32 %v780_v11, %v713_v4 }
 0x276   :  { %v795_v5 = vpop.permute.xlu1 %794 }
 0x277   :  { %v790_v21 = vpop.permute.xlu0 %789  ;;  %v812_v38 = vmul.f32 %v795_v5, %v716_v59 }
 0x278   :  { %v811_v52 = vmul.f32 %v790_v21, %v715_v13 }
 0x284   :  { %v1611_v44 = vpop.f32.mrb[0].mxu0 }
 0x285   :  { %v984_v1 = vadd.f32 %v1611_v44, %v799_v58  ;;  %v919_v3 = vpop.f32.mrb[1].mxu0 }
 0x286   :  { %v982_v9 = vadd.f32 %v919_v3, %v797_v15  ;;  %v1612_v23 = vpop.f32.mrb[2].mxu0  ;;  %v2592_v3 = vld [vmem:[%s2836_s4] ss:$0 sm:$0xff] }
 0x287   :  { %1001 = vst.msk [vmem:[#allocation4 + $0x10] sm:$0xff] %vm68_vm0, %v984_v1  ;;  %v985_v17 = vadd.f32 %v1612_v23, %v800_v39  ;;  %v922_v18 = vpop.f32.mrb[3].mxu0 }
 0x288   :  { %999 = vst.msk [vmem:[#allocation4] sm:$0xff] %vm68_vm0, %v982_v9  ;;  %v983_v20 = vadd.f32 %v922_v18, %v798_v57 }
 0x289   :  { %1002 = vst.msk [vmem:[#allocation4 + $0x18] sm:$0xff] %vm68_vm0, %v985_v17 }
 0x28a   :  { %1000 = vst.msk [vmem:[#allocation4 + $0x8] sm:$0xff] %vm68_vm0, %v983_v20 }
 0x28c   :  { %v1615_v53 = vpop.f32.mrb[4].mxu0 }
 0x28d   :  { %v988_v56 = vadd.f32 %v1615_v53, %v803_v19  ;;  %v935_v30 = vpop.f32.mrb[5].mxu0 }
 0x28e   :  { %v986_v36 = vadd.f32 %v935_v30, %v801_v34  ;;  %v1616_v43 = vpop.f32.mrb[6].mxu0  ;;  %v1068_v23 = vld [vmem:[#allocation4 + $0x10] sm:$0xff] }
 0x28f   :  { %1005 = vst.msk [vmem:[#allocation4 + $0x30] sm:$0xff] %vm68_vm0, %v988_v56  ;;  %v989_v51 = vadd.f32 %v1616_v43, %v804_v16  ;;  %v938_v31 = vpop.f32.mrb[7].mxu0  ;;  %v1066_v1 = vld [vmem:[#allocation4] sm:$0xff] }
 0x290   :  { %1003 = vst.msk [vmem:[#allocation4 + $0x20] sm:$0xff] %vm68_vm0, %v986_v36  ;;  %v987_v63 = vadd.f32 %v938_v31, %v802_v0  ;;  %v1069_v37 = vld [vmem:[#allocation4 + $0x18] sm:$0xff] }
 0x291   :  { %1006 = vst.msk [vmem:[#allocation4 + $0x38] sm:$0xff] %vm68_vm0, %v989_v51  ;;  %v1067_v25 = vld [vmem:[#allocation4 + $0x8] sm:$0xff] }
 0x292   :  { %1004 = vst.msk [vmem:[#allocation4 + $0x28] sm:$0xff] %vm68_vm0, %v987_v63 }
 0x294   :  { %v1619_v47 = vpop.f32.mrb[8].mxu0 }
 0x295   :  { %v992_v7 = vadd.f32 %v1619_v47, %v807_v29  ;;  %v951_v32 = vpop.f32.mrb[9].mxu0 }
 0x296   :  { %v990_v55 = vadd.f32 %v951_v32, %v805_v49  ;;  %v1620_v48 = vpop.f32.mrb[10].mxu0  ;;  %v1072_v11 = vld [vmem:[#allocation4 + $0x30] sm:$0xff] }
 0x297   :  { %1009 = vst.msk [vmem:[#allocation4 + $0x50] sm:$0xff] %vm68_vm0, %v992_v7  ;;  %v993_v28 = vadd.f32 %v1620_v48, %v808_v50  ;;  %v954_v8 = vpop.f32.mrb[11].mxu0  ;;  %v1070_v16 = vld [vmem:[#allocation4 + $0x20] sm:$0xff] }
 0x298   :  { %1007 = vst.msk [vmem:[#allocation4 + $0x40] sm:$0xff] %vm68_vm0, %v990_v55  ;;  %v991_v60 = vadd.f32 %v954_v8, %v806_v54  ;;  %v1073_v32 = vld [vmem:[#allocation4 + $0x38] sm:$0xff] }
 0x299   :  { %1010 = vst.msk [vmem:[#allocation4 + $0x58] sm:$0xff] %vm68_vm0, %v993_v28  ;;  %v1071_v22 = vld [vmem:[#allocation4 + $0x28] sm:$0xff] }
 0x29a   :  { %1008 = vst.msk [vmem:[#allocation4 + $0x48] sm:$0xff] %vm68_vm0, %v991_v60 }
 0x29e   :  { %v1623_v45 = vpop.f32.mrb[12].mxu0 }
 0x29f   :  { %v996_v27 = vadd.f32 %v1623_v45, %v811_v52  ;;  %v967_v42 = vpop.f32.mrb[13].mxu0  ;;  %v1074_v55 = vld [vmem:[#allocation4 + $0x40] sm:$0xff] }
 0x2a0   :  { %v994_v58 = vadd.f32 %v967_v42, %v809_v41  ;;  %v1624_v10 = vpop.f32.mrb[14].mxu0  ;;  %v1076_v41 = vld [vmem:[#allocation4 + $0x50] sm:$0xff] }
 0x2a1   :  { %1013 = vst.msk [vmem:[#allocation4 + $0x70] sm:$0xff] %vm68_vm0, %v996_v27  ;;  %v997_v15 = vadd.f32 %v1624_v10, %v812_v38  ;;  %v970_v44 = vpop.f32.mrb[15].mxu0  ;;  %v1075_v42 = vld [vmem:[#allocation4 + $0x48] sm:$0xff] }
 0x2a2   :  { %1011 = vst.msk [vmem:[#allocation4 + $0x60] sm:$0xff] %vm68_vm0, %v994_v58  ;;  %v995_v39 = vadd.f32 %v970_v44, %v810_v46 }
 0x2a3   :  { %1014 = vst.msk [vmem:[#allocation4 + $0x78] sm:$0xff] %vm68_vm0, %v997_v15 }
 0x2a4   :  { %1012 = vst.msk [vmem:[#allocation4 + $0x68] sm:$0xff] %vm68_vm0, %v995_v39 }
 0x2cc   :  { %v1101_v57 = vpop.permute.xlu0 %1100 }
 0x2cd   :  { %v1178_v6 = vmul.f32 %v1101_v57, %v1066_v1 }
 0x2cf   :  { %v2595_v9 = vadd.f32 %v2592_v3, %v1178_v6 }
 0x2d0   :  { %v1111_v17 = vpop.permute.xlu0 %1110 }
 0x2d1   :  { %v1233_v18 = vmin.f32 %v2595_v9, 0.0  ;;  %v1106_v35 = vpop.permute.xlu1 %1105  ;;  %v1180_v20 = vmul.f32 %v1111_v17, %v1068_v23  ;;  %vm1217_vm9 = vcmp.gt.f32.partialorder %v2595_v9, 0.0 }
 0x2d2   :  { %v1179_v26 = vmul.f32 %v1106_v35, %v1067_v25  ;;  %v1078_v25 = vld [vmem:[#allocation4 + $0x60] sm:$0xff] }
 0x2d3   :  { %v1249_v12 = vmul.f32 1.442695, %v1233_v18  ;;  %v2599_v40 = vadd.f32 %v2592_v3, %v1180_v20  ;;  %v1077_v18 = vld [vmem:[#allocation4 + $0x58] sm:$0xff] }
 0x2d4   :  { %v2602_v19 = vadd.f32 %v2592_v3, %v1179_v26 }
 0x2d5   :  { %1756 = vpow2.f32 %v1249_v12  ;;  %v1235_v34 = vmin.f32 %v2599_v40, 0.0  ;;  %v1116_v53 = vpop.permute.xlu1 %1115  ;;  %v1121_v56 = vpop.permute.xlu0 %1120  ;;  %vm1219_vm8 = vcmp.gt.f32.partialorder %v2599_v40, 0.0 }
 0x2d6   :  { %v1234_v30 = vmin.f32 %v2602_v19, 0.0  ;;  %v1181_v0 = vmul.f32 %v1116_v53, %v1069_v37  ;;  %v1182_v14 = vmul.f32 %v1121_v56, %v1070_v16  ;;  %vm1218_vm10 = vcmp.gt.f32.partialorder %v2602_v19, 0.0 }
 0x2d7   :  { %v1253_v36 = vmul.f32 1.442695, %v1235_v34 }
 0x2d8   :  { %v1251_v43 = vmul.f32 1.442695, %v1234_v30  ;;  %v2607_v51 = vadd.f32 %v2592_v3, %v1181_v0  ;;  %v2610_v31 = vadd.f32 %v2592_v3, %v1182_v14 }
 0x2d9   :  { %1758 = vpow2.f32 %v1253_v36  ;;  %v1126_v2 = vpop.permute.xlu1 %1125  ;;  %v1131_v63 = vpop.permute.xlu0 %1130 }
 0x2da   :  { %1760 = vpow2.f32 %v1251_v43  ;;  %v1236_v33 = vmin.f32 %v2607_v51, 0.0  ;;  %v1237_v62 = vmin.f32 %v2610_v31, 0.0  ;;  %v1183_v29 = vmul.f32 %v1126_v2, %v1071_v22 }
 0x2db   :  { %v1184_v49 = vmul.f32 %v1131_v63, %v1072_v11  ;;  %vm1220_vm11 = vcmp.gt.f32.partialorder %v2607_v51, 0.0  ;;  %vm1221_vm1 = vcmp.gt.f32.partialorder %v2610_v31, 0.0 }
 0x2dc   :  { %v1255_v61 = vmul.f32 1.442695, %v1236_v33  ;;  %v1257_v47 = vmul.f32 1.442695, %v1237_v62  ;;  %v2615_v50 = vadd.f32 %v2592_v3, %v1183_v29  ;;  %v1079_v29 = vld [vmem:[#allocation4 + $0x68] sm:$0xff] }
 0x2dd   :  { %v2618_v7 = vadd.f32 %v2592_v3, %v1184_v49  ;;  %v1136_v54 = vpop.permute.xlu1 %1135  ;;  %v1141_v48 = vpop.permute.xlu0 %1140 }
 0x2de   :  { %1762 = vpow2.f32 %v1255_v61  ;;  %v1185_v28 = vmul.f32 %v1136_v54, %v1073_v32  ;;  %v1186_v8 = vmul.f32 %v1141_v48, %v1074_v55  ;;  %v1238_v21 = vmin.f32 %v2615_v50, 0.0  ;;  %v1080_v32 = vld [vmem:[#allocation4 + $0x70] sm:$0xff]  ;;  %v1081_v48 = vld [vmem:[#allocation4 + $0x78] sm:$0xff] }
 0x2df   :  { %v1757_v13 = vpop.eup %1756  ;;  %1764 = vpow2.f32 %v1257_v47  ;;  %v1239_v60 = vmin.f32 %v2618_v7, 0.0  ;;  %vm1222_vm2 = vcmp.gt.f32.partialorder %v2615_v50, 0.0  ;;  %vm1223_vm5 = vcmp.gt.f32.partialorder %v2618_v7, 0.0 }
 0x2e0   :  { %v2623_v4 = vadd.f32 %v2592_v3, %v1185_v28  ;;  %v2626_v59 = vadd.f32 %v2592_v3, %v1186_v8  ;;  %v1540_v5 = vadd.f32 -1.0, %v1757_v13  ;;  %v1259_v24 = vmul.f32 1.442695, %v1238_v21 }
 0x2e1   :  { %v1146_v52 = vpop.permute.xlu1 %1145  ;;  %v1151_v45 = vpop.permute.xlu0 %1150  ;;  %v1261_v38 = vmul.f32 1.442695, %v1239_v60 }
 0x2e2   :  { %v1240_v27 = vmin.f32 %v2623_v4, 0.0  ;;  %1766 = vpow2.f32 %v1259_v24  ;;  %v1241_v58 = vmin.f32 %v2626_v59, 0.0  ;;  %v1187_v10 = vmul.f32 %v1146_v52, %v1075_v42 }
 0x2e3   :  { %v1759_v46 = vpop.eup %1758  ;;  %v1188_v15 = vmul.f32 %v1151_v45, %v1076_v41  ;;  %1768 = vpow2.f32 %v1261_v38  ;;  %v1297_v57 = vsel %vm1217_vm9, %v2595_v9, %v1540_v5  ;;  %vm1224_vm3 = vcmp.gt.f32.partialorder %v2623_v4, 0.0 }
 0x2e4   :  { %v1761_v44 = vpop.eup %1760  ;;  %v1542_v39 = vadd.f32 -1.0, %v1759_v46  ;;  %v1263_v1 = vmul.f32 1.442695, %v1240_v27  ;;  %v1265_v6 = vmul.f32 1.442695, %v1241_v58  ;;  %v2634_v23 = vadd.f32 %v2592_v3, %v1187_v10  ;;  %1313 = vst.msk [vmem:[%s2837_s7] sm:$0xff] %vm68_vm0, %v1297_v57 }
 0x2e5   :  { %v2637_v17 = vadd.f32 %v2592_v3, %v1188_v15  ;;  %v1156_v35 = vpop.permute.xlu1 %1155  ;;  %v1161_v20 = vpop.permute.xlu0 %1160  ;;  %v1541_v26 = vadd.f32 -1.0, %v1761_v44  ;;  %vm1225_vm12 = vcmp.gt.f32.partialorder %v2626_v59, 0.0  ;;  %vm1481_vm9 = vcmask 64512  }
 0x2e6   :  { %v1299_v9 = vsel %vm1219_vm8, %v2599_v40, %v1542_v39  ;;  %1770 = vpow2.f32 %v1263_v1  ;;  %v1189_v12 = vmul.f32 %v1156_v35, %v1077_v18  ;;  %v1190_v34 = vmul.f32 %v1161_v20, %v1078_v25 }
 0x2e7   :  { %1315 = vst.msk [vmem:[%s2837_s7 + $0x10] sm:$0xff] %vm68_vm0, %v1299_v9  ;;  %1772 = vpow2.f32 %v1265_v6  ;;  %v1242_v37 = vmin.f32 %v2634_v23, 0.0  ;;  %v1243_v16 = vmin.f32 %v2637_v17, 0.0  ;;  %v1298_v30 = vsel %vm1218_vm10, %v2602_v19, %v1541_v26 }
 0x2e8   :  { %v1763_v53 = vpop.eup %1762  ;;  %v2654_v56 = vadd.f32 %v2592_v3, %v1189_v12  ;;  %v2657_v40 = vadd.f32 %v2592_v3, %v1190_v34  ;;  %1314 = vst.msk [vmem:[%s2837_s7 + $0x8] sm:$0xff] %vm68_vm0, %v1298_v30  ;;  %v1329_v2 = vpack.c.bf16 %v1298_v30, %v1297_v57  ;;  %vm1226_vm13 = vcmp.gt.f32.partialorder %v2634_v23, 0.0 }
 0x2e9   :  { %v1765_v0 = vpop.eup %1764  ;;  %v1543_v14 = vadd.f32 -1.0, %v1763_v53  ;;  %v1267_v36 = vmul.f32 1.442695, %v1242_v37  ;;  %v1166_v43 = vpop.permute.xlu1 %1165  ;;  %v1269_v33 = vmul.f32 1.442695, %v1243_v16  ;;  %vm1227_vm4 = vcmp.gt.f32.partialorder %v2637_v17, 0.0 }
 0x2ea   :  { %v1544_v63 = vadd.f32 -1.0, %v1765_v0  ;;  %v1244_v22 = vmin.f32 %v2654_v56, 0.0  ;;  %v1171_v11 = vpop.permute.xlu0 %1170  ;;  %v1245_v19 = vmin.f32 %v2657_v40, 0.0  ;;  %1629 = vmatprep.mubr.msk.bf16.mxu1 %vm68_vm0, %v1329_v2  ;;  %v1191_v47 = vmul.f32 %v1166_v43, %v1079_v29 }
 0x2eb   :  { %v1300_v62 = vsel %vm1220_vm11, %v2607_v51, %v1543_v14  ;;  %1774 = vpow2.f32 %v1267_v36  ;;  %v1192_v55 = vmul.f32 %v1171_v11, %v1080_v32  ;;  %vm1228_vm14 = vcmp.gt.f32.partialorder %v2654_v56, 0.0 }
 0x2ec   :  { %1316 = vst.msk [vmem:[%s2837_s7 + $0x18] sm:$0xff] %vm68_vm0, %v1300_v62  ;;  %v1301_v49 = vsel %vm1221_vm1, %v2610_v31, %v1544_v63  ;;  %1776 = vpow2.f32 %v1269_v33  ;;  %v1271_v61 = vmul.f32 1.442695, %v1244_v22  ;;  %v1767_v51 = vpop.eup %1766  ;;  %v1273_v54 = vmul.f32 1.442695, %v1245_v19 }
 0x2ed   :  { %1317 = vst.msk [vmem:[%s2837_s7 + $0x20] sm:$0xff] %vm68_vm0, %v1301_v49  ;;  %v1330_v8 = vpack.c.bf16 %v1300_v62, %v1299_v9  ;;  %v1769_v13 = vpop.eup %1768  ;;  %v1545_v21 = vadd.f32 -1.0, %v1767_v51  ;;  %v2680_v31 = vadd.f32 %v2592_v3, %v1191_v47  ;;  %v2684_v24 = vadd.f32 %v2592_v3, %v1192_v55  ;;  %v1556_v33 = vld [vmem:[%s2838_s6] ss:$0 sm:$0xff] }
 0x2ee   :  { %v1176_v28 = vpop.permute.xlu1 %1175  ;;  %1778 = vpow2.f32 %v1271_v61  ;;  %v1546_v5 = vadd.f32 -1.0, %v1769_v13  ;;  %vm1229_vm6 = vcmp.gt.f32.partialorder %v2657_v40, 0.0 }
 0x2ef   :  { %v1193_v60 = vmul.f32 %v1176_v28, %v1081_v48  ;;  %1780 = vpow2.f32 %v1273_v54  ;;  %1630 = vmatmul.mubr.msk.bf16.vlgmr.msra.gmra.mrb[0].mxu1 %vm68_vm0, %v1330_v8  ;;  %v1302_v41 = vsel %vm1222_vm2, %v2615_v50, %v1545_v21  ;;  %v1246_v45 = vmin.f32 %v2680_v31, 0.0 }
 0x2f0   :  { %v1771_v52 = vpop.eup %1770  ;;  %1318 = vst.msk [vmem:[%s2837_s7 + $0x28] sm:$0xff] %vm68_vm0, %v1302_v41  ;;  %v1303_v42 = vsel %vm1223_vm5, %v2618_v7, %v1546_v5  ;;  %v1247_v58 = vmin.f32 %v2684_v24, 0.0  ;;  %v1331_v7 = vpack.c.bf16 %v1302_v41, %v1301_v49  ;;  %vm1230_vm15 = vcmp.gt.f32.partialorder %v2680_v31, 0.0 }
 0x2f1   :  { %v2691_v38 = vadd.f32 %v2592_v3, %v1193_v60  ;;  %v1773_v27 = vpop.eup %1772  ;;  %v1547_v46 = vadd.f32 -1.0, %v1771_v52  ;;  %1319 = vst.msk [vmem:[%s2837_s7 + $0x30] sm:$0xff] %vm68_vm0, %v1303_v42  ;;  %v1275_v50 = vmul.f32 1.442695, %v1246_v45  ;;  %vm1231_vm7 = vcmp.gt.f32.partialorder %v2684_v24, 0.0 }
 0x2f2   :  { %v1548_v3 = vadd.f32 -1.0, %v1773_v27  ;;  %v1277_v44 = vmul.f32 1.442695, %v1247_v58  ;;  %1633 = vmatprep.mubr.msk.bf16.mxu1 %vm68_vm0, %v1331_v7 }
 0x2f3   :  { %v1248_v10 = vmin.f32 %v2691_v38, 0.0  ;;  %v1304_v15 = vsel %vm1224_vm3, %v2623_v4, %v1547_v46  ;;  %1782 = vpow2.f32 %v1275_v50  ;;  %vm1232_vm8 = vcmp.gt.f32.partialorder %v2691_v38, 0.0 }
 0x2f4   :  { %1320 = vst.msk [vmem:[%s2837_s7 + $0x38] sm:$0xff] %vm68_vm0, %v1304_v15  ;;  %v1305_v39 = vsel %vm1225_vm12, %v2626_v59, %v1548_v3  ;;  %v1332_v57 = vpack.c.bf16 %v1304_v15, %v1303_v42  ;;  %1784 = vpow2.f32 %v1277_v44 }
 0x2f5   :  { %v1279_v1 = vmul.f32 1.442695, %v1248_v10  ;;  %v1775_v6 = vpop.eup %1774  ;;  %1321 = vst.msk [vmem:[%s2837_s7 + $0x40] sm:$0xff] %vm68_vm0, %v1305_v39 }
 0x2f6   :  { %v1777_v4 = vpop.eup %1776  ;;  %v1549_v18 = vadd.f32 -1.0, %v1775_v6 }
 0x2f7   :  { %1786 = vpow2.f32 %v1279_v1  ;;  %v1550_v35 = vadd.f32 -1.0, %v1777_v4  ;;  %1634 = vmatmul.mubr.msk.bf16.gmra.mrb[4].mxu1 %vm68_vm0, %v1332_v57 }
 0x2f8   :  { %v1779_v59 = vpop.eup %1778  ;;  %v1306_v25 = vsel %vm1226_vm13, %v2634_v23, %v1549_v18 }
 0x2f9   :  { %v1781_v20 = vpop.eup %1780  ;;  %1322 = vst.msk [vmem:[%s2837_s7 + $0x48] sm:$0xff] %vm68_vm0, %v1306_v25  ;;  %v1307_v26 = vsel %vm1227_vm4, %v2637_v17, %v1550_v35  ;;  %v1551_v9 = vadd.f32 -1.0, %v1779_v59  ;;  %v1333_v12 = vpack.c.bf16 %v1306_v25, %v1305_v39 }
 0x2fa   :  { %1323 = vst.msk [vmem:[%s2837_s7 + $0x50] sm:$0xff] %vm68_vm0, %v1307_v26  ;;  %v1552_v23 = vadd.f32 -1.0, %v1781_v20 }
 0x2fb   :  { %v1308_v34 = vsel %vm1228_vm14, %v2654_v56, %v1551_v9  ;;  %1637 = vmatprep.mubr.msk.bf16.mxu1 %vm68_vm0, %v1333_v12 }
 0x2fc   :  { %1324 = vst.msk [vmem:[%s2837_s7 + $0x58] sm:$0xff] %vm68_vm0, %v1308_v34  ;;  %v1309_v17 = vsel %vm1229_vm6, %v2657_v40, %v1552_v23  ;;  %v1334_v37 = vpack.c.bf16 %v1308_v34, %v1307_v26 }
 0x2fd   :  { %1325 = vst.msk [vmem:[%s2837_s7 + $0x60] sm:$0xff] %vm68_vm0, %v1309_v17  ;;  %v1783_v53 = vpop.eup %1782 }
 0x2fe   :  { %v1785_v16 = vpop.eup %1784  ;;  %v1553_v56 = vadd.f32 -1.0, %v1783_v53 }
 0x2ff   :  { %1638 = vmatmul.mubr.msk.bf16.gmra.mrb[8].mxu1 %vm68_vm0, %v1334_v37  ;;  %v1554_v0 = vadd.f32 -1.0, %v1785_v16 }
 0x300   :  { %v1310_v14 = vsel %vm1230_vm15, %v2680_v31, %v1553_v56 }
 0x301   :  { %v1787_v30 = vpop.eup %1786  ;;  %1326 = vst.msk [vmem:[%s2837_s7 + $0x68] sm:$0xff] %vm68_vm0, %v1310_v14  ;;  %v1311_v36 = vsel %vm1231_vm7, %v2684_v24, %v1554_v0  ;;  %v1335_v43 = vpack.c.bf16 %v1310_v14, %v1309_v17 }
 0x302   :  { %v1555_v40 = vadd.f32 -1.0, %v1787_v30  ;;  %1327 = vst.msk [vmem:[%s2837_s7 + $0x70] sm:$0xff] %vm68_vm0, %v1311_v36 }
 0x303   :  { %1641 = vmatprep.mubr.msk.bf16.mxu1 %vm68_vm0, %v1335_v43 }
 0x304   :  { %v1312_v2 = vsel %vm1232_vm8, %v2691_v38, %v1555_v40 }
 0x305   :  { %1328 = vst.msk [vmem:[%s2837_s7 + $0x78] sm:$0xff] %vm68_vm0, %v1312_v2  ;;  %v1336_v63 = vpack.c.bf16 %v1312_v2, %v1311_v36 }
 0x307   :  { %1642 = vmatmul.mubr.msk.bf16.gmra.mrb[12].mxu1 %vm68_vm0, %v1336_v63 }
 0x3c2   :  { %v1631_v22 = vpop.f32.mrb[0].mxu1 }
 0x3c3   :  { %v1427_v11 = vadd.f32 %v1631_v22, %v1556_v33  ;;  %v1418_v62 = vpop.f32.mrb[1].mxu1 }
 0x3c4   :  { %v1419_v19 = vadd.f32 %v1556_v33, %v1418_v62  ;;  %v1632_v29 = vpop.f32.mrb[2].mxu1 }
 0x3c5   :  { %1484 = vst.msk [vmem:[%s2839_s8 + $0x10] sm:$0xff] %vm1481_vm9, %v1427_v11  ;;  %v1430_v49 = vadd.f32 %v1632_v29, %v1556_v33  ;;  %v1421_v61 = vpop.f32.mrb[3].mxu1 }
 0x3c6   :  { %1482 = vst.msk [vmem:[%s2839_s8] sm:$0xff] %vm1481_vm9, %v1419_v19  ;;  %v1422_v47 = vadd.f32 %v1556_v33, %v1421_v61 }
 0x3c7   :  { %1485 = vst.msk [vmem:[%s2839_s8 + $0x18] sm:$0xff] %vm1481_vm9, %v1430_v49 }
 0x3c8   :  { %1483 = vst.msk [vmem:[%s2839_s8 + $0x8] sm:$0xff] %vm1481_vm9, %v1422_v47 }
 0x3ca   :  { %v1635_v32 = vpop.f32.mrb[4].mxu1 }
 0x3cb   :  { %v1443_v51 = vadd.f32 %v1635_v32, %v1556_v33  ;;  %v1434_v54 = vpop.f32.mrb[5].mxu1 }
 0x3cc   :  { %v1435_v55 = vadd.f32 %v1556_v33, %v1434_v54  ;;  %v1636_v48 = vpop.f32.mrb[6].mxu1 }
 0x3cd   :  { %1488 = vst.msk [vmem:[%s2839_s8 + $0x30] sm:$0xff] %vm1481_vm9, %v1443_v51  ;;  %v1446_v28 = vadd.f32 %v1636_v48, %v1556_v33  ;;  %v1437_v8 = vpop.f32.mrb[7].mxu1 }
 0x3ce   :  { %1486 = vst.msk [vmem:[%s2839_s8 + $0x20] sm:$0xff] %vm1481_vm9, %v1435_v55  ;;  %v1438_v13 = vadd.f32 %v1556_v33, %v1437_v8 }
 0x3cf   :  { %1489 = vst.msk [vmem:[%s2839_s8 + $0x38] sm:$0xff] %vm1481_vm9, %v1446_v28 }
 0x3d0   :  { %1487 = vst.msk [vmem:[%s2839_s8 + $0x28] sm:$0xff] %vm1481_vm9, %v1438_v13 }
 0x3d2   :  { %v1639_v21 = vpop.f32.mrb[8].mxu1 }
 0x3d3   :  { %v1459_v31 = vadd.f32 %v1639_v21, %v1556_v33  ;;  %v1450_v60 = vpop.f32.mrb[9].mxu1 }
 0x3d4   :  { %v1451_v5 = vadd.f32 %v1556_v33, %v1450_v60  ;;  %v1640_v24 = vpop.f32.mrb[10].mxu1 }
 0x3d5   :  { %1492 = vst.msk [vmem:[%s2839_s8 + $0x50] sm:$0xff] %vm1481_vm9, %v1459_v31  ;;  %v1462_v52 = vadd.f32 %v1640_v24, %v1556_v33  ;;  %v1453_v41 = vpop.f32.mrb[11].mxu1 }
 0x3d6   :  { %1490 = vst.msk [vmem:[%s2839_s8 + $0x40] sm:$0xff] %vm1481_vm9, %v1451_v5  ;;  %v1454_v45 = vadd.f32 %v1556_v33, %v1453_v41 }
 0x3d7   :  { %1493 = vst.msk [vmem:[%s2839_s8 + $0x58] sm:$0xff] %vm1481_vm9, %v1462_v52 }
 0x3d8   :  { %1491 = vst.msk [vmem:[%s2839_s8 + $0x48] sm:$0xff] %vm1481_vm9, %v1454_v45 }
 0x3da   :  { %v1643_v38 = vpop.f32.mrb[12].mxu1 }
 0x3db   :  { %v1475_v27 = vadd.f32 %v1643_v38, %v1556_v33  ;;  %v1466_v42 = vpop.f32.mrb[13].mxu1 }
 0x3dc   :  { %v1467_v46 = vadd.f32 %v1556_v33, %v1466_v42  ;;  %v1644_v58 = vpop.f32.mrb[14].mxu1 }
 0x3dd   :  { %1496 = vst.msk [vmem:[%s2839_s8 + $0x70] sm:$0xff] %vm1481_vm9, %v1475_v27  ;;  %v1478_v3 = vadd.f32 %v1644_v58, %v1556_v33  ;;  %v1469_v50 = vpop.f32.mrb[15].mxu1 }
 0x3de   :  { %1494 = vst.msk [vmem:[%s2839_s8 + $0x60] sm:$0xff] %vm1481_vm9, %v1467_v46  ;;  %v1470_v10 = vadd.f32 %v1556_v33, %v1469_v50 }
 0x3df   :  { %1497 = vst.msk [vmem:[%s2839_s8 + $0x78] sm:$0xff] %vm1481_vm9, %v1478_v3 }
 0x3e0   :  { %1495 = vst.msk [vmem:[%s2839_s8 + $0x68] sm:$0xff] %vm1481_vm9, %v1470_v10 }

</bundles_post_ra>
